<compile_context>
chip_gen: v7x
topology: tpu7x:2x2x1
jax: 0.10.0
libtpu: 0.0.40
codegen_flags: <defaults>
</compile_context>

<pallas_src>
import numpy as np
import jax
import jax.numpy as jnp
from jax.experimental import pallas as pl
from jax.experimental.pallas import tpu as pltpu

_BN_EPS = 1e-5


def _round_up(v, m):
    return ((v + m - 1) // m) * m


# ---------------------------------------------------------------------------
# Weight folding: (3, 3, Cin, Cout) HWIO -> (Cout, 9*Cpad); the per-tap channel
# dim is zero-padded to a multiple of 8 so im2col rows start at sublane-aligned
# offsets.  Column index = (kh*3 + kw)*Cpad + c, matching the in-kernel patch.
# ---------------------------------------------------------------------------
def fold_conv3x3_weight(w):
    kh, kw, cin, cout = w.shape
    cpad = _round_up(cin, 8)
    wp = jnp.zeros((kh, kw, cpad, cout), w.dtype).at[:, :, :cin, :].set(w)
    return jnp.transpose(wp, (3, 0, 1, 2)).reshape(cout, kh * kw * cpad)


def fold_params(params, use_1x1conv):
    """One-time parameter preparation (kept out of the per-call wrapper)."""
    fp = {
        "w1f": fold_conv3x3_weight(params["w1"]),
        "b1": params["b1"].reshape(-1, 1),
        "g1": params["g1"].reshape(-1, 1),
        "be1": params["be1"].reshape(-1, 1),
        "w2f": fold_conv3x3_weight(params["w2"]),
        "b2": params["b2"].reshape(-1, 1),
        "g2": params["g2"].reshape(-1, 1),
        "be2": params["be2"].reshape(-1, 1),
    }
    if use_1x1conv:
        fp["w3"] = params["w3"].T                      # (Cout, Cin)
        fp["b3"] = params["b3"].reshape(-1, 1)
    return fp


# ---------------------------------------------------------------------------
# Precomputed 0/1 validity masks for the 9 taps of a 3x3 "same" conv on a
# lane-flattened (n, h, w) -> n*HW + h*W + w layout.  Built with numpy, so
# under jit they are baked-in constants (no wrapper runtime ops).
# ---------------------------------------------------------------------------
def _make_tap_masks(N, H, W):
    r = np.arange(H)[:, None]
    c = np.arange(W)[None, :]
    masks = np.zeros((9, 1, N * H * W), np.float32)
    for kh in range(3):
        dh = kh - 1
        for kw in range(3):
            dw = kw - 1
            ok = ((r + dh >= 0) & (r + dh < H) &
                  (c + dw >= 0) & (c + dw < W)).astype(np.float32)
            masks[kh * 3 + kw, 0, :] = np.tile(ok.reshape(-1), N)
    return masks


# ---------------------------------------------------------------------------
# Fully fused residual-block kernel (single program, whole batch in VMEM).
# ---------------------------------------------------------------------------
def _make_residual_kernel(N, H, W, cin, cout, cpad1, cpad2, use_proj):
    HW = H * W
    NHW = N * HW
    inv_cnt = 1.0 / float(NHW)

    def bn_affine(y, g, be):
        # Training-mode BatchNorm (batch mean, biased variance), centered 2-pass.
        mean = jnp.sum(y, axis=1, keepdims=True) * inv_cnt
        yc = y - mean
        var = jnp.sum(yc * yc, axis=1, keepdims=True) * inv_cnt
        return yc * (g * jax.lax.rsqrt(var + _BN_EPS)) + be

    def build_patch(act, cpad, m_ref, patch_ref):
        # act: (cpad, N*HW) f32, channel rows >= true C are zero.
        # One XLU lane-roll + one masked multiply per tap; every store is a
        # full cpad-row (8-sublane-aligned) group -> no partial-sublane stores.
        for kh in range(3):
            for kw in range(3):
                t = kh * 3 + kw
                d = (kh - 1) * W + (kw - 1)
                if d == 0:
                    tap = act
                else:
                    tap = pltpu.roll(act, shift=(-d) % NHW, axis=1) * m_ref[t]
                patch_ref[t * cpad:(t + 1) * cpad, :] = tap.astype(patch_ref.dtype)

    def body(x_ref, m_ref, w1_ref, b1_ref, g1_ref, be1_ref,
             w2_ref, b2_ref, g2_ref, be2_ref,
             o_ref, xa_ref, p1_ref, p2_ref, skip_fn):
        # --- stage X as a channel-major lane-dense slab (cpad1, N*HW) ---------
        if cin != cpad1:
            xa_ref[...] = jnp.zeros_like(xa_ref)
        for n in range(N):
            xa_ref[0:cin, n * HW:(n + 1) * HW] = x_ref[n]
        xa = xa_ref[...]                                     # (cpad1, N*HW)

        skip = skip_fn(xa)                                   # (cout, N*HW) f32

        # --- conv1 (single im2col MXU contraction over the batch) + BN1 + ReLU
        build_patch(xa, cpad1, m_ref, p1_ref)
        y1 = jnp.dot(w1_ref[...], p1_ref[...].astype(w1_ref.dtype),
                     preferred_element_type=jnp.float32) + b1_ref[...]
        a1 = jnp.maximum(bn_affine(y1, g1_ref[...], be1_ref[...]), 0.0)

        # --- conv2 + BN2 -------------------------------------------------------
        if cout == cpad2:
            act2 = a1
        else:
            act2 = jnp.concatenate(
                [a1, jnp.zeros((cpad2 - cout, NHW), a1.dtype)], axis=0)
        build_patch(act2, cpad2, m_ref, p2_ref)
        y2 = jnp.dot(w2_ref[...], p2_ref[...].astype(w2_ref.dtype),
                     preferred_element_type=jnp.float32) + b2_ref[...]
        y2 = bn_affine(y2, g2_ref[...], be2_ref[...])

        # --- residual add + ReLU, write back per batch element -----------------
        out = jnp.maximum(y2 + skip, 0.0)                    # (cout, N*HW)
        for n in range(N):
            o_ref[n] = out[:, n * HW:(n + 1) * HW]

    if use_proj:
        def kernel(x_ref, m_ref, w1_ref, b1_ref, g1_ref, be1_ref,
                   w2_ref, b2_ref, g2_ref, be2_ref, w3_ref, b3_ref,
                   o_ref, xa_ref, p1_ref, p2_ref):
            def skip_fn(xa):
                return jnp.dot(w3_ref[...], xa[0:cin, :],
                               preferred_element_type=jnp.float32) + b3_ref[...]
            body(x_ref, m_ref, w1_ref, b1_ref, g1_ref, be1_ref,
                 w2_ref, b2_ref, g2_ref, be2_ref,
                 o_ref, xa_ref, p1_ref, p2_ref, skip_fn)
    else:
        def kernel(x_ref, m_ref, w1_ref, b1_ref, g1_ref, be1_ref,
                   w2_ref, b2_ref, g2_ref, be2_ref,
                   o_ref, xa_ref, p1_ref, p2_ref):
            def skip_fn(xa):
                return xa[0:cout, :]
            body(x_ref, m_ref, w1_ref, b1_ref, g1_ref, be1_ref,
                 w2_ref, b2_ref, g2_ref, be2_ref,
                 o_ref, xa_ref, p1_ref, p2_ref, skip_fn)

    return kernel


# ---------------------------------------------------------------------------
# Wrapper: free reshapes only; one pallas_call; whole arrays resident in VMEM.
# mxu_dtype=jnp.bfloat16 casts the matmul operands (weights + patch) for the
# v6e/v7x native-bf16 MXU while keeping f32 accumulation and epilogue.
# ---------------------------------------------------------------------------
def residual_forward(x_nchw, fparams, use_1x1conv, mxu_dtype=jnp.float32):
    x = x_nchw.astype(jnp.float32)
    N, Cin, H, W = x.shape
    Cout = fparams["w1f"].shape[0]
    HW = H * W
    NHW = N * HW
    cpad1 = fparams["w1f"].shape[1] // 9
    cpad2 = fparams["w2f"].shape[1] // 9
    if not use_1x1conv:
        assert Cin == Cout, "identity skip requires input_channels == num_channels"

    kernel = _make_residual_kernel(N, H, W, Cin, Cout, cpad1, cpad2, use_1x1conv)

    masks = jnp.asarray(_make_tap_masks(N, H, W))            # (9, 1, N*HW) const
    args = [x.reshape(N, Cin, HW), masks,
            fparams["w1f"].astype(mxu_dtype), fparams["b1"],
            fparams["g1"], fparams["be1"],
            fparams["w2f"].astype(mxu_dtype), fparams["b2"],
            fparams["g2"], fparams["be2"]]
    if use_1x1conv:
        args += [fparams["w3"], fparams["b3"]]

    vmem = pl.BlockSpec(memory_space=pltpu.MemorySpace.VMEM)
    out = pl.pallas_call(
        kernel,
        out_shape=jax.ShapeDtypeStruct((N, Cout, HW), jnp.float32),
        in_specs=[vmem] * len(args),
        out_specs=vmem,
        scratch_shapes=[
            pltpu.VMEM((cpad1, NHW), jnp.float32),           # staged input slab
            pltpu.VMEM((9 * cpad1, NHW), jnp.float32),       # conv1 im2col patch
            pltpu.VMEM((9 * cpad2, NHW), jnp.float32),       # conv2 im2col patch
        ],
    )(*args)
    return out.reshape(N, Cout, H, W)


# ---------------------------------------------------------------------------
# Pure-JAX reference (mirrors the PyTorch forward) for a silent sanity check.
# ---------------------------------------------------------------------------
def residual_reference(x_nchw, params, use_1x1conv):
    x = x_nchw.astype(jnp.float32)

    def conv(x, w, b, padding):
        y = jax.lax.conv_general_dilated(
            x, w, (1, 1), padding,
            dimension_numbers=("NCHW", "HWIO", "NCHW"))
        return y + b.reshape(1, -1, 1, 1)

    def bn(y, gamma, beta):
        mean = y.mean(axis=(0, 2, 3), keepdims=True)
        var = y.var(axis=(0, 2, 3), keepdims=True)
        return ((y - mean) * jax.lax.rsqrt(var + _BN_EPS)
                * gamma.reshape(1, -1, 1, 1) + beta.reshape(1, -1, 1, 1))

    y = jax.nn.relu(bn(conv(x, params["w1"], params["b1"], "SAME"),
                       params["g1"], params["be1"]))
    y = bn(conv(y, params["w2"], params["b2"], "SAME"),
           params["g2"], params["be2"])
    if use_1x1conv:
        x = conv(x, params["w3"].reshape(1, 1, *params["w3"].shape),
                 params["b3"], "VALID")
    return jax.nn.relu(y + x)


def make_params(key, cin, cout, use_1x1conv):
    ks = jax.random.split(key, 6)
    p = {
        "w1": jax.random.normal(ks[0], (3, 3, cin, cout), jnp.float32) * 0.1,
        "b1": jax.random.normal(ks[1], (cout,), jnp.float32) * 0.1,
        "w2": jax.random.normal(ks[2], (3, 3, cout, cout), jnp.float32) * 0.1,
        "b2": jax.random.normal(ks[3], (cout,), jnp.float32) * 0.1,
        "g1": jnp.ones((cout,), jnp.float32),
        "be1": jnp.zeros((cout,), jnp.float32),
        "g2": jnp.ones((cout,), jnp.float32),
        "be2": jnp.zeros((cout,), jnp.float32),
    }
    if use_1x1conv:
        p["w3"] = jax.random.normal(ks[4], (cin, cout), jnp.float32) * 0.1
        p["b3"] = jax.random.normal(ks[5], (cout,), jnp.float32) * 0.1
    return p


if __name__ == "__main__":
    key = jax.random.PRNGKey(0)
    kx, kp1, kp2 = jax.random.split(key, 3)

    N, H, W = 2, 16, 16

    # Config A: Residual(4, 8, use_1x1conv=True)  -- channel-changing block
    x_a = jax.random.normal(kx, (N, 4, H, W), jnp.float32)   # NCHW like PyTorch
    params_a = make_params(kp1, 4, 8, use_1x1conv=True)
    fp_a = fold_params(params_a, use_1x1conv=True)
    fwd_a = jax.jit(lambda x: residual_forward(x, fp_a, True))
    out_a = fwd_a(x_a)
    jax.block_until_ready(out_a)
    ref_a = residual_reference(x_a, params_a, True)
    assert out_a.shape == (N, 8, H, W)
    assert jnp.allclose(out_a, ref_a, rtol=1e-3, atol=1e-3)

    # Config B: Residual(8, 8)  -- identity skip (module defaults)
    x_b = jax.random.normal(kx, (N, 8, H, W), jnp.float32)
    params_b = make_params(kp2, 8, 8, use_1x1conv=False)
    fp_b = fold_params(params_b, use_1x1conv=False)
    fwd_b = jax.jit(lambda x: residual_forward(x, fp_b, False))
    out_b = fwd_b(x_b)
    jax.block_until_ready(out_b)
    ref_b = residual_reference(x_b, params_b, False)
    assert out_b.shape == (N, 8, H, W)
    assert jnp.allclose(out_b, ref_b, rtol=1e-3, atol=1e-3)

    # Config A with bf16 MXU operands (v6e/v7x fast path), f32 accumulation.
    fwd_a16 = jax.jit(lambda x: residual_forward(x, fp_a, True, jnp.bfloat16))
    out_a16 = fwd_a16(x_a)
    jax.block_until_ready(out_a16)
    assert jnp.allclose(out_a16, ref_a, rtol=5e-2, atol=5e-2)

    print("KERNEL_OK")
</pallas_src>

<mosaic_0001>
module attributes {stable_mosaic.version = 11 : i64} {
  func.func @kernel(%arg0: memref<2x4x256xf32, #tpu.memory_space<vmem>>, %arg1: memref<9x1x512xf32, #tpu.memory_space<vmem>>, %arg2: memref<8x72xf32, #tpu.memory_space<vmem>>, %arg3: memref<8x1xf32, #tpu.memory_space<vmem>>, %arg4: memref<8x1xf32, #tpu.memory_space<vmem>>, %arg5: memref<8x1xf32, #tpu.memory_space<vmem>>, %arg6: memref<8x72xf32, #tpu.memory_space<vmem>>, %arg7: memref<8x1xf32, #tpu.memory_space<vmem>>, %arg8: memref<8x1xf32, #tpu.memory_space<vmem>>, %arg9: memref<8x1xf32, #tpu.memory_space<vmem>>, %arg10: memref<8x4xf32, #tpu.memory_space<vmem>>, %arg11: memref<8x1xf32, #tpu.memory_space<vmem>>, %arg12: memref<2x8x256xf32, #tpu.memory_space<vmem>>, %arg13: memref<8x512xf32, #tpu.memory_space<vmem>>, %arg14: memref<72x512xf32, #tpu.memory_space<vmem>>, %arg15: memref<72x512xf32, #tpu.memory_space<vmem>>) attributes {dimension_semantics = [], scalar_prefetch = 0 : i64, scratch_operands = 3 : i64, tpu.core_type = #tpu.core_type<tc>} {
    %cst = arith.constant 0.000000e+00 : f32
    %0 = vector.broadcast %cst : f32 to vector<8x512xf32>
    %c0 = arith.constant 0 : index
    %c0_0 = arith.constant 0 : index
    %1 = vector.load %arg13[%c0, %c0_0] : memref<8x512xf32, #tpu.memory_space<vmem>>, vector<8x512xf32>
    tpu.vector_store %arg13[%c0, %c0_0], %0 {strides = array<i32>} : memref<8x512xf32, #tpu.memory_space<vmem>>, vector<8x512xf32>,
    %c0_1 = arith.constant 0 : index
    %c0_2 = arith.constant 0 : index
    %c0_3 = arith.constant 0 : index
    %2 = vector.load %arg0[%c0_1, %c0_2, %c0_3] : memref<2x4x256xf32, #tpu.memory_space<vmem>>, vector<1x4x256xf32>
    %3 = vector.shape_cast %2 : vector<1x4x256xf32> to vector<4x256xf32>
    %c0_4 = arith.constant 0 : index
    %c0_5 = arith.constant 0 : index
    %4 = vector.load %arg13[%c0_4, %c0_5] : memref<8x512xf32, #tpu.memory_space<vmem>>, vector<4x256xf32>
    tpu.vector_store %arg13[%c0_4, %c0_5], %3 {strides = array<i32>} : memref<8x512xf32, #tpu.memory_space<vmem>>, vector<4x256xf32>,
    %c1 = arith.constant 1 : index
    %c0_6 = arith.constant 0 : index
    %c0_7 = arith.constant 0 : index
    %5 = vector.load %arg0[%c1, %c0_6, %c0_7] : memref<2x4x256xf32, #tpu.memory_space<vmem>>, vector<1x4x256xf32>
    %6 = vector.shape_cast %5 : vector<1x4x256xf32> to vector<4x256xf32>
    %c0_8 = arith.constant 0 : index
    %c256 = arith.constant 256 : index
    %7 = vector.load %arg13[%c0_8, %c256] : memref<8x512xf32, #tpu.memory_space<vmem>>, vector<4x256xf32>
    tpu.vector_store %arg13[%c0_8, %c256], %6 {strides = array<i32>} : memref<8x512xf32, #tpu.memory_space<vmem>>, vector<4x256xf32>,
    %c0_9 = arith.constant 0 : index
    %c0_10 = arith.constant 0 : index
    %8 = vector.load %arg13[%c0_9, %c0_10] : memref<8x512xf32, #tpu.memory_space<vmem>>, vector<8x512xf32>
    %c0_11 = arith.constant 0 : index
    %c0_12 = arith.constant 0 : index
    %9 = vector.load %arg10[%c0_11, %c0_12] : memref<8x4xf32, #tpu.memory_space<vmem>>, vector<8x4xf32>
    %10 = vector.extract_strided_slice %8 {offsets = [0, 0], sizes = [4, 512], strides = [1, 1]} : vector<8x512xf32> to vector<4x512xf32>
    %cst_13 = arith.constant dense<0.000000e+00> : vector<8x512xf32>
    %11 = tpu.matmul %9, %10, %cst_13 {dimension_numbers = #tpu.dot_dimension_numbers<[1], [0], [0], [1], [0, 0, 1, 1], [], []>} : vector<8x4xf32>, vector<4x512xf32>, vector<8x512xf32> -> vector<8x512xf32>
    %c0_14 = arith.constant 0 : index
    %c0_15 = arith.constant 0 : index
    %12 = vector.load %arg11[%c0_14, %c0_15] : memref<8x1xf32, #tpu.memory_space<vmem>>, vector<8x1xf32>
    %13 = vector.broadcast %12 : vector<8x1xf32> to vector<8x512xf32>
    %14 = arith.addf %11, %13 : vector<8x512xf32>
    %c17_i32 = arith.constant 17 : i32
    %15 = tpu.dynamic_rotate %8 by %c17_i32 dim 1 : vector<8x512xf32>, i32 -> vector<8x512xf32>
    %c0_16 = arith.constant 0 : index
    %c0_17 = arith.constant 0 : index
    %c0_18 = arith.constant 0 : index
    %16 = vector.load %arg1[%c0_16, %c0_17, %c0_18] : memref<9x1x512xf32, #tpu.memory_space<vmem>>, vector<1x1x512xf32>
    %17 = vector.shape_cast %16 : vector<1x1x512xf32> to vector<1x512xf32>
    %18 = vector.broadcast %17 : vector<1x512xf32> to vector<8x512xf32>
    %19 = arith.mulf %15, %18 : vector<8x512xf32>
    %c0_19 = arith.constant 0 : index
    %c0_20 = arith.constant 0 : index
    %20 = vector.load %arg14[%c0_19, %c0_20] : memref<72x512xf32, #tpu.memory_space<vmem>>, vector<8x512xf32>
    tpu.vector_store %arg14[%c0_19, %c0_20], %19 {strides = array<i32>} : memref<72x512xf32, #tpu.memory_space<vmem>>, vector<8x512xf32>,
    %c16_i32 = arith.constant 16 : i32
    %21 = tpu.dynamic_rotate %8 by %c16_i32 dim 1 : vector<8x512xf32>, i32 -> vector<8x512xf32>
    %c1_21 = arith.constant 1 : index
    %c0_22 = arith.constant 0 : index
    %c0_23 = arith.constant 0 : index
    %22 = vector.load %arg1[%c1_21, %c0_22, %c0_23] : memref<9x1x512xf32, #tpu.memory_space<vmem>>, vector<1x1x512xf32>
    %23 = vector.shape_cast %22 : vector<1x1x512xf32> to vector<1x512xf32>
    %24 = vector.broadcast %23 : vector<1x512xf32> to vector<8x512xf32>
    %25 = arith.mulf %21, %24 : vector<8x512xf32>
    %c8 = arith.constant 8 : index
    %c0_24 = arith.constant 0 : index
    %26 = vector.load %arg14[%c8, %c0_24] : memref<72x512xf32, #tpu.memory_space<vmem>>, vector<8x512xf32>
    tpu.vector_store %arg14[%c8, %c0_24], %25 {strides = array<i32>} : memref<72x512xf32, #tpu.memory_space<vmem>>, vector<8x512xf32>,
    %c15_i32 = arith.constant 15 : i32
    %27 = tpu.dynamic_rotate %8 by %c15_i32 dim 1 : vector<8x512xf32>, i32 -> vector<8x512xf32>
    %c2 = arith.constant 2 : index
    %c0_25 = arith.constant 0 : index
    %c0_26 = arith.constant 0 : index
    %28 = vector.load %arg1[%c2, %c0_25, %c0_26] : memref<9x1x512xf32, #tpu.memory_space<vmem>>, vector<1x1x512xf32>
    %29 = vector.shape_cast %28 : vector<1x1x512xf32> to vector<1x512xf32>
    %30 = vector.broadcast %29 : vector<1x512xf32> to vector<8x512xf32>
    %31 = arith.mulf %27, %30 : vector<8x512xf32>
    %c16 = arith.constant 16 : index
    %c0_27 = arith.constant 0 : index
    %32 = vector.load %arg14[%c16, %c0_27] : memref<72x512xf32, #tpu.memory_space<vmem>>, vector<8x512xf32>
    tpu.vector_store %arg14[%c16, %c0_27], %31 {strides = array<i32>} : memref<72x512xf32, #tpu.memory_space<vmem>>, vector<8x512xf32>,
    %c1_i32 = arith.constant 1 : i32
    %33 = tpu.dynamic_rotate %8 by %c1_i32 dim 1 : vector<8x512xf32>, i32 -> vector<8x512xf32>
    %c3 = arith.constant 3 : index
    %c0_28 = arith.constant 0 : index
    %c0_29 = arith.constant 0 : index
    %34 = vector.load %arg1[%c3, %c0_28, %c0_29] : memref<9x1x512xf32, #tpu.memory_space<vmem>>, vector<1x1x512xf32>
    %35 = vector.shape_cast %34 : vector<1x1x512xf32> to vector<1x512xf32>
    %36 = vector.broadcast %35 : vector<1x512xf32> to vector<8x512xf32>
    %37 = arith.mulf %33, %36 : vector<8x512xf32>
    %c24 = arith.constant 24 : index
    %c0_30 = arith.constant 0 : index
    %38 = vector.load %arg14[%c24, %c0_30] : memref<72x512xf32, #tpu.memory_space<vmem>>, vector<8x512xf32>
    tpu.vector_store %arg14[%c24, %c0_30], %37 {strides = array<i32>} : memref<72x512xf32, #tpu.memory_space<vmem>>, vector<8x512xf32>,
    %c32 = arith.constant 32 : index
    %c0_31 = arith.constant 0 : index
    %39 = vector.load %arg14[%c32, %c0_31] : memref<72x512xf32, #tpu.memory_space<vmem>>, vector<8x512xf32>
    tpu.vector_store %arg14[%c32, %c0_31], %8 {strides = array<i32>} : memref<72x512xf32, #tpu.memory_space<vmem>>, vector<8x512xf32>,
    %c511_i32 = arith.constant 511 : i32
    %40 = tpu.dynamic_rotate %8 by %c511_i32 dim 1 : vector<8x512xf32>, i32 -> vector<8x512xf32>
    %c5 = arith.constant 5 : index
    %c0_32 = arith.constant 0 : index
    %c0_33 = arith.constant 0 : index
    %41 = vector.load %arg1[%c5, %c0_32, %c0_33] : memref<9x1x512xf32, #tpu.memory_space<vmem>>, vector<1x1x512xf32>
    %42 = vector.shape_cast %41 : vector<1x1x512xf32> to vector<1x512xf32>
    %43 = vector.broadcast %42 : vector<1x512xf32> to vector<8x512xf32>
    %44 = arith.mulf %40, %43 : vector<8x512xf32>
    %c40 = arith.constant 40 : index
    %c0_34 = arith.constant 0 : index
    %45 = vector.load %arg14[%c40, %c0_34] : memref<72x512xf32, #tpu.memory_space<vmem>>, vector<8x512xf32>
    tpu.vector_store %arg14[%c40, %c0_34], %44 {strides = array<i32>} : memref<72x512xf32, #tpu.memory_space<vmem>>, vector<8x512xf32>,
    %c497_i32 = arith.constant 497 : i32
    %46 = tpu.dynamic_rotate %8 by %c497_i32 dim 1 : vector<8x512xf32>, i32 -> vector<8x512xf32>
    %c6 = arith.constant 6 : index
    %c0_35 = arith.constant 0 : index
    %c0_36 = arith.constant 0 : index
    %47 = vector.load %arg1[%c6, %c0_35, %c0_36] : memref<9x1x512xf32, #tpu.memory_space<vmem>>, vector<1x1x512xf32>
    %48 = vector.shape_cast %47 : vector<1x1x512xf32> to vector<1x512xf32>
    %49 = vector.broadcast %48 : vector<1x512xf32> to vector<8x512xf32>
    %50 = arith.mulf %46, %49 : vector<8x512xf32>
    %c48 = arith.constant 48 : index
    %c0_37 = arith.constant 0 : index
    %51 = vector.load %arg14[%c48, %c0_37] : memref<72x512xf32, #tpu.memory_space<vmem>>, vector<8x512xf32>
    tpu.vector_store %arg14[%c48, %c0_37], %50 {strides = array<i32>} : memref<72x512xf32, #tpu.memory_space<vmem>>, vector<8x512xf32>,
    %c496_i32 = arith.constant 496 : i32
    %52 = tpu.dynamic_rotate %8 by %c496_i32 dim 1 : vector<8x512xf32>, i32 -> vector<8x512xf32>
    %c7 = arith.constant 7 : index
    %c0_38 = arith.constant 0 : index
    %c0_39 = arith.constant 0 : index
    %53 = vector.load %arg1[%c7, %c0_38, %c0_39] : memref<9x1x512xf32, #tpu.memory_space<vmem>>, vector<1x1x512xf32>
    %54 = vector.shape_cast %53 : vector<1x1x512xf32> to vector<1x512xf32>
    %55 = vector.broadcast %54 : vector<1x512xf32> to vector<8x512xf32>
    %56 = arith.mulf %52, %55 : vector<8x512xf32>
    %c56 = arith.constant 56 : index
    %c0_40 = arith.constant 0 : index
    %57 = vector.load %arg14[%c56, %c0_40] : memref<72x512xf32, #tpu.memory_space<vmem>>, vector<8x512xf32>
    tpu.vector_store %arg14[%c56, %c0_40], %56 {strides = array<i32>} : memref<72x512xf32, #tpu.memory_space<vmem>>, vector<8x512xf32>,
    %c495_i32 = arith.constant 495 : i32
    %58 = tpu.dynamic_rotate %8 by %c495_i32 dim 1 : vector<8x512xf32>, i32 -> vector<8x512xf32>
    %c8_41 = arith.constant 8 : index
    %c0_42 = arith.constant 0 : index
    %c0_43 = arith.constant 0 : index
    %59 = vector.load %arg1[%c8_41, %c0_42, %c0_43] : memref<9x1x512xf32, #tpu.memory_space<vmem>>, vector<1x1x512xf32>
    %60 = vector.shape_cast %59 : vector<1x1x512xf32> to vector<1x512xf32>
    %61 = vector.broadcast %60 : vector<1x512xf32> to vector<8x512xf32>
    %62 = arith.mulf %58, %61 : vector<8x512xf32>
    %c64 = arith.constant 64 : index
    %c0_44 = arith.constant 0 : index
    %63 = vector.load %arg14[%c64, %c0_44] : memref<72x512xf32, #tpu.memory_space<vmem>>, vector<8x512xf32>
    tpu.vector_store %arg14[%c64, %c0_44], %62 {strides = array<i32>} : memref<72x512xf32, #tpu.memory_space<vmem>>, vector<8x512xf32>,
    %c0_45 = arith.constant 0 : index
    %c0_46 = arith.constant 0 : index
    %64 = vector.load %arg2[%c0_45, %c0_46] : memref<8x72xf32, #tpu.memory_space<vmem>>, vector<8x72xf32>
    %c0_47 = arith.constant 0 : index
    %c0_48 = arith.constant 0 : index
    %65 = vector.load %arg14[%c0_47, %c0_48] : memref<72x512xf32, #tpu.memory_space<vmem>>, vector<72x512xf32>
    %cst_49 = arith.constant dense<0.000000e+00> : vector<8x512xf32>
    %66 = tpu.matmul %64, %65, %cst_49 {dimension_numbers = #tpu.dot_dimension_numbers<[1], [0], [0], [1], [0, 0, 1, 1], [], []>} : vector<8x72xf32>, vector<72x512xf32>, vector<8x512xf32> -> vector<8x512xf32>
    %c0_50 = arith.constant 0 : index
    %c0_51 = arith.constant 0 : index
    %67 = vector.load %arg3[%c0_50, %c0_51] : memref<8x1xf32, #tpu.memory_space<vmem>>, vector<8x1xf32>
    %68 = vector.broadcast %67 : vector<8x1xf32> to vector<8x512xf32>
    %69 = arith.addf %66, %68 : vector<8x512xf32>
    %c0_52 = arith.constant 0 : index
    %c0_53 = arith.constant 0 : index
    %70 = vector.load %arg4[%c0_52, %c0_53] : memref<8x1xf32, #tpu.memory_space<vmem>>, vector<8x1xf32>
    %c0_54 = arith.constant 0 : index
    %c0_55 = arith.constant 0 : index
    %71 = vector.load %arg5[%c0_54, %c0_55] : memref<8x1xf32, #tpu.memory_space<vmem>>, vector<8x1xf32>
    %cst_56 = arith.constant dense<0.000000e+00> : vector<8xf32>
    %72 = vector.multi_reduction <add>, %69, %cst_56 [1] : vector<8x512xf32> to vector<8xf32>
    %73 = vector.shape_cast %72 : vector<8xf32> to vector<8x1xf32>
    %cst_57 = arith.constant 0.001953125 : f32
    %74 = vector.broadcast %cst_57 : f32 to vector<8x1xf32>
    %75 = arith.mulf %73, %74 : vector<8x1xf32>
    %76 = vector.broadcast %75 : vector<8x1xf32> to vector<8x512xf32>
    %77 = arith.subf %69, %76 : vector<8x512xf32>
    %78 = arith.mulf %77, %77 : vector<8x512xf32>
    %cst_58 = arith.constant dense<0.000000e+00> : vector<8xf32>
    %79 = vector.multi_reduction <add>, %78, %cst_58 [1] : vector<8x512xf32> to vector<8xf32>
    %80 = vector.shape_cast %79 : vector<8xf32> to vector<8x1xf32>
    %cst_59 = arith.constant 0.001953125 : f32
    %81 = vector.broadcast %cst_59 : f32 to vector<8x1xf32>
    %82 = arith.mulf %80, %81 : vector<8x1xf32>
    %cst_60 = arith.constant 9.99999974E-6 : f32
    %83 = vector.broadcast %cst_60 : f32 to vector<8x1xf32>
    %84 = arith.addf %82, %83 : vector<8x1xf32>
    %85 = math.rsqrt %84 : vector<8x1xf32>
    %86 = arith.mulf %70, %85 : vector<8x1xf32>
    %87 = vector.broadcast %86 : vector<8x1xf32> to vector<8x512xf32>
    %88 = arith.mulf %77, %87 : vector<8x512xf32>
    %89 = vector.broadcast %71 : vector<8x1xf32> to vector<8x512xf32>
    %90 = arith.addf %88, %89 : vector<8x512xf32>
    %cst_61 = arith.constant 0.000000e+00 : f32
    %91 = vector.broadcast %cst_61 : f32 to vector<8x512xf32>
    %92 = arith.maximumf %90, %91 : vector<8x512xf32>
    %c17_i32_62 = arith.constant 17 : i32
    %93 = tpu.dynamic_rotate %92 by %c17_i32_62 dim 1 : vector<8x512xf32>, i32 -> vector<8x512xf32>
    %c0_63 = arith.constant 0 : index
    %c0_64 = arith.constant 0 : index
    %c0_65 = arith.constant 0 : index
    %94 = vector.load %arg1[%c0_63, %c0_64, %c0_65] : memref<9x1x512xf32, #tpu.memory_space<vmem>>, vector<1x1x512xf32>
    %95 = vector.shape_cast %94 : vector<1x1x512xf32> to vector<1x512xf32>
    %96 = vector.broadcast %95 : vector<1x512xf32> to vector<8x512xf32>
    %97 = arith.mulf %93, %96 : vector<8x512xf32>
    %c0_66 = arith.constant 0 : index
    %c0_67 = arith.constant 0 : index
    %98 = vector.load %arg15[%c0_66, %c0_67] : memref<72x512xf32, #tpu.memory_space<vmem>>, vector<8x512xf32>
    tpu.vector_store %arg15[%c0_66, %c0_67], %97 {strides = array<i32>} : memref<72x512xf32, #tpu.memory_space<vmem>>, vector<8x512xf32>,
    %c16_i32_68 = arith.constant 16 : i32
    %99 = tpu.dynamic_rotate %92 by %c16_i32_68 dim 1 : vector<8x512xf32>, i32 -> vector<8x512xf32>
    %c1_69 = arith.constant 1 : index
    %c0_70 = arith.constant 0 : index
    %c0_71 = arith.constant 0 : index
    %100 = vector.load %arg1[%c1_69, %c0_70, %c0_71] : memref<9x1x512xf32, #tpu.memory_space<vmem>>, vector<1x1x512xf32>
    %101 = vector.shape_cast %100 : vector<1x1x512xf32> to vector<1x512xf32>
    %102 = vector.broadcast %101 : vector<1x512xf32> to vector<8x512xf32>
    %103 = arith.mulf %99, %102 : vector<8x512xf32>
    %c8_72 = arith.constant 8 : index
    %c0_73 = arith.constant 0 : index
    %104 = vector.load %arg15[%c8_72, %c0_73] : memref<72x512xf32, #tpu.memory_space<vmem>>, vector<8x512xf32>
    tpu.vector_store %arg15[%c8_72, %c0_73], %103 {strides = array<i32>} : memref<72x512xf32, #tpu.memory_space<vmem>>, vector<8x512xf32>,
    %c15_i32_74 = arith.constant 15 : i32
    %105 = tpu.dynamic_rotate %92 by %c15_i32_74 dim 1 : vector<8x512xf32>, i32 -> vector<8x512xf32>
    %c2_75 = arith.constant 2 : index
    %c0_76 = arith.constant 0 : index
    %c0_77 = arith.constant 0 : index
    %106 = vector.load %arg1[%c2_75, %c0_76, %c0_77] : memref<9x1x512xf32, #tpu.memory_space<vmem>>, vector<1x1x512xf32>
    %107 = vector.shape_cast %106 : vector<1x1x512xf32> to vector<1x512xf32>
    %108 = vector.broadcast %107 : vector<1x512xf32> to vector<8x512xf32>
    %109 = arith.mulf %105, %108 : vector<8x512xf32>
    %c16_78 = arith.constant 16 : index
    %c0_79 = arith.constant 0 : index
    %110 = vector.load %arg15[%c16_78, %c0_79] : memref<72x512xf32, #tpu.memory_space<vmem>>, vector<8x512xf32>
    tpu.vector_store %arg15[%c16_78, %c0_79], %109 {strides = array<i32>} : memref<72x512xf32, #tpu.memory_space<vmem>>, vector<8x512xf32>,
    %c1_i32_80 = arith.constant 1 : i32
    %111 = tpu.dynamic_rotate %92 by %c1_i32_80 dim 1 : vector<8x512xf32>, i32 -> vector<8x512xf32>
    %c3_81 = arith.constant 3 : index
    %c0_82 = arith.constant 0 : index
    %c0_83 = arith.constant 0 : index
    %112 = vector.load %arg1[%c3_81, %c0_82, %c0_83] : memref<9x1x512xf32, #tpu.memory_space<vmem>>, vector<1x1x512xf32>
    %113 = vector.shape_cast %112 : vector<1x1x512xf32> to vector<1x512xf32>
    %114 = vector.broadcast %113 : vector<1x512xf32> to vector<8x512xf32>
    %115 = arith.mulf %111, %114 : vector<8x512xf32>
    %c24_84 = arith.constant 24 : index
    %c0_85 = arith.constant 0 : index
    %116 = vector.load %arg15[%c24_84, %c0_85] : memref<72x512xf32, #tpu.memory_space<vmem>>, vector<8x512xf32>
    tpu.vector_store %arg15[%c24_84, %c0_85], %115 {strides = array<i32>} : memref<72x512xf32, #tpu.memory_space<vmem>>, vector<8x512xf32>,
    %c32_86 = arith.constant 32 : index
    %c0_87 = arith.constant 0 : index
    %117 = vector.load %arg15[%c32_86, %c0_87] : memref<72x512xf32, #tpu.memory_space<vmem>>, vector<8x512xf32>
    tpu.vector_store %arg15[%c32_86, %c0_87], %92 {strides = array<i32>} : memref<72x512xf32, #tpu.memory_space<vmem>>, vector<8x512xf32>,
    %c511_i32_88 = arith.constant 511 : i32
    %118 = tpu.dynamic_rotate %92 by %c511_i32_88 dim 1 : vector<8x512xf32>, i32 -> vector<8x512xf32>
    %c5_89 = arith.constant 5 : index
    %c0_90 = arith.constant 0 : index
    %c0_91 = arith.constant 0 : index
    %119 = vector.load %arg1[%c5_89, %c0_90, %c0_91] : memref<9x1x512xf32, #tpu.memory_space<vmem>>, vector<1x1x512xf32>
    %120 = vector.shape_cast %119 : vector<1x1x512xf32> to vector<1x512xf32>
    %121 = vector.broadcast %120 : vector<1x512xf32> to vector<8x512xf32>
    %122 = arith.mulf %118, %121 : vector<8x512xf32>
    %c40_92 = arith.constant 40 : index
    %c0_93 = arith.constant 0 : index
    %123 = vector.load %arg15[%c40_92, %c0_93] : memref<72x512xf32, #tpu.memory_space<vmem>>, vector<8x512xf32>
    tpu.vector_store %arg15[%c40_92, %c0_93], %122 {strides = array<i32>} : memref<72x512xf32, #tpu.memory_space<vmem>>, vector<8x512xf32>,
    %c497_i32_94 = arith.constant 497 : i32
    %124 = tpu.dynamic_rotate %92 by %c497_i32_94 dim 1 : vector<8x512xf32>, i32 -> vector<8x512xf32>
    %c6_95 = arith.constant 6 : index
    %c0_96 = arith.constant 0 : index
    %c0_97 = arith.constant 0 : index
    %125 = vector.load %arg1[%c6_95, %c0_96, %c0_97] : memref<9x1x512xf32, #tpu.memory_space<vmem>>, vector<1x1x512xf32>
    %126 = vector.shape_cast %125 : vector<1x1x512xf32> to vector<1x512xf32>
    %127 = vector.broadcast %126 : vector<1x512xf32> to vector<8x512xf32>
    %128 = arith.mulf %124, %127 : vector<8x512xf32>
    %c48_98 = arith.constant 48 : index
    %c0_99 = arith.constant 0 : index
    %129 = vector.load %arg15[%c48_98, %c0_99] : memref<72x512xf32, #tpu.memory_space<vmem>>, vector<8x512xf32>
    tpu.vector_store %arg15[%c48_98, %c0_99], %128 {strides = array<i32>} : memref<72x512xf32, #tpu.memory_space<vmem>>, vector<8x512xf32>,
    %c496_i32_100 = arith.constant 496 : i32
    %130 = tpu.dynamic_rotate %92 by %c496_i32_100 dim 1 : vector<8x512xf32>, i32 -> vector<8x512xf32>
    %c7_101 = arith.constant 7 : index
    %c0_102 = arith.constant 0 : index
    %c0_103 = arith.constant 0 : index
    %131 = vector.load %arg1[%c7_101, %c0_102, %c0_103] : memref<9x1x512xf32, #tpu.memory_space<vmem>>, vector<1x1x512xf32>
    %132 = vector.shape_cast %131 : vector<1x1x512xf32> to vector<1x512xf32>
    %133 = vector.broadcast %132 : vector<1x512xf32> to vector<8x512xf32>
    %134 = arith.mulf %130, %133 : vector<8x512xf32>
    %c56_104 = arith.constant 56 : index
    %c0_105 = arith.constant 0 : index
    %135 = vector.load %arg15[%c56_104, %c0_105] : memref<72x512xf32, #tpu.memory_space<vmem>>, vector<8x512xf32>
    tpu.vector_store %arg15[%c56_104, %c0_105], %134 {strides = array<i32>} : memref<72x512xf32, #tpu.memory_space<vmem>>, vector<8x512xf32>,
    %c495_i32_106 = arith.constant 495 : i32
    %136 = tpu.dynamic_rotate %92 by %c495_i32_106 dim 1 : vector<8x512xf32>, i32 -> vector<8x512xf32>
    %c8_107 = arith.constant 8 : index
    %c0_108 = arith.constant 0 : index
    %c0_109 = arith.constant 0 : index
    %137 = vector.load %arg1[%c8_107, %c0_108, %c0_109] : memref<9x1x512xf32, #tpu.memory_space<vmem>>, vector<1x1x512xf32>
    %138 = vector.shape_cast %137 : vector<1x1x512xf32> to vector<1x512xf32>
    %139 = vector.broadcast %138 : vector<1x512xf32> to vector<8x512xf32>
    %140 = arith.mulf %136, %139 : vector<8x512xf32>
    %c64_110 = arith.constant 64 : index
    %c0_111 = arith.constant 0 : index
    %141 = vector.load %arg15[%c64_110, %c0_111] : memref<72x512xf32, #tpu.memory_space<vmem>>, vector<8x512xf32>
    tpu.vector_store %arg15[%c64_110, %c0_111], %140 {strides = array<i32>} : memref<72x512xf32, #tpu.memory_space<vmem>>, vector<8x512xf32>,
    %c0_112 = arith.constant 0 : index
    %c0_113 = arith.constant 0 : index
    %142 = vector.load %arg6[%c0_112, %c0_113] : memref<8x72xf32, #tpu.memory_space<vmem>>, vector<8x72xf32>
    %c0_114 = arith.constant 0 : index
    %c0_115 = arith.constant 0 : index
    %143 = vector.load %arg15[%c0_114, %c0_115] : memref<72x512xf32, #tpu.memory_space<vmem>>, vector<72x512xf32>
    %cst_116 = arith.constant dense<0.000000e+00> : vector<8x512xf32>
    %144 = tpu.matmul %142, %143, %cst_116 {dimension_numbers = #tpu.dot_dimension_numbers<[1], [0], [0], [1], [0, 0, 1, 1], [], []>} : vector<8x72xf32>, vector<72x512xf32>, vector<8x512xf32> -> vector<8x512xf32>
    %c0_117 = arith.constant 0 : index
    %c0_118 = arith.constant 0 : index
    %145 = vector.load %arg7[%c0_117, %c0_118] : memref<8x1xf32, #tpu.memory_space<vmem>>, vector<8x1xf32>
    %146 = vector.broadcast %145 : vector<8x1xf32> to vector<8x512xf32>
    %147 = arith.addf %144, %146 : vector<8x512xf32>
    %c0_119 = arith.constant 0 : index
    %c0_120 = arith.constant 0 : index
    %148 = vector.load %arg8[%c0_119, %c0_120] : memref<8x1xf32, #tpu.memory_space<vmem>>, vector<8x1xf32>
    %c0_121 = arith.constant 0 : index
    %c0_122 = arith.constant 0 : index
    %149 = vector.load %arg9[%c0_121, %c0_122] : memref<8x1xf32, #tpu.memory_space<vmem>>, vector<8x1xf32>
    %cst_123 = arith.constant dense<0.000000e+00> : vector<8xf32>
    %150 = vector.multi_reduction <add>, %147, %cst_123 [1] : vector<8x512xf32> to vector<8xf32>
    %151 = vector.shape_cast %150 : vector<8xf32> to vector<8x1xf32>
    %cst_124 = arith.constant 0.001953125 : f32
    %152 = vector.broadcast %cst_124 : f32 to vector<8x1xf32>
    %153 = arith.mulf %151, %152 : vector<8x1xf32>
    %154 = vector.broadcast %153 : vector<8x1xf32> to vector<8x512xf32>
    %155 = arith.subf %147, %154 : vector<8x512xf32>
    %156 = arith.mulf %155, %155 : vector<8x512xf32>
    %cst_125 = arith.constant dense<0.000000e+00> : vector<8xf32>
    %157 = vector.multi_reduction <add>, %156, %cst_125 [1] : vector<8x512xf32> to vector<8xf32>
    %158 = vector.shape_cast %157 : vector<8xf32> to vector<8x1xf32>
    %cst_126 = arith.constant 0.001953125 : f32
    %159 = vector.broadcast %cst_126 : f32 to vector<8x1xf32>
    %160 = arith.mulf %158, %159 : vector<8x1xf32>
    %cst_127 = arith.constant 9.99999974E-6 : f32
    %161 = vector.broadcast %cst_127 : f32 to vector<8x1xf32>
    %162 = arith.addf %160, %161 : vector<8x1xf32>
    %163 = math.rsqrt %162 : vector<8x1xf32>
    %164 = arith.mulf %148, %163 : vector<8x1xf32>
    %165 = vector.broadcast %164 : vector<8x1xf32> to vector<8x512xf32>
    %166 = arith.mulf %155, %165 : vector<8x512xf32>
    %167 = vector.broadcast %149 : vector<8x1xf32> to vector<8x512xf32>
    %168 = arith.addf %166, %167 : vector<8x512xf32>
    %169 = arith.addf %168, %14 : vector<8x512xf32>
    %cst_128 = arith.constant 0.000000e+00 : f32
    %170 = vector.broadcast %cst_128 : f32 to vector<8x512xf32>
    %171 = arith.maximumf %169, %170 : vector<8x512xf32>
    %172 = vector.extract_strided_slice %171 {offsets = [0, 0], sizes = [8, 256], strides = [1, 1]} : vector<8x512xf32> to vector<8x256xf32>
    %c0_129 = arith.constant 0 : index
    %c0_130 = arith.constant 0 : index
    %c0_131 = arith.constant 0 : index
    %173 = vector.load %arg12[%c0_129, %c0_130, %c0_131] : memref<2x8x256xf32, #tpu.memory_space<vmem>>, vector<1x8x256xf32>
    %174 = vector.shape_cast %173 : vector<1x8x256xf32> to vector<8x256xf32>
    %175 = vector.shape_cast %172 : vector<8x256xf32> to vector<1x8x256xf32>
    tpu.vector_store %arg12[%c0_129, %c0_130, %c0_131], %175 {strides = array<i32>} : memref<2x8x256xf32, #tpu.memory_space<vmem>>, vector<1x8x256xf32>,
    %176 = vector.extract_strided_slice %171 {offsets = [0, 256], sizes = [8, 256], strides = [1, 1]} : vector<8x512xf32> to vector<8x256xf32>
    %c1_132 = arith.constant 1 : index
    %c0_133 = arith.constant 0 : index
    %c0_134 = arith.constant 0 : index
    %177 = vector.load %arg12[%c1_132, %c0_133, %c0_134] : memref<2x8x256xf32, #tpu.memory_space<vmem>>, vector<1x8x256xf32>
    %178 = vector.shape_cast %177 : vector<1x8x256xf32> to vector<8x256xf32>
    %179 = vector.shape_cast %176 : vector<8x256xf32> to vector<1x8x256xf32>
    tpu.vector_store %arg12[%c1_132, %c0_133, %c0_134], %179 {strides = array<i32>} : memref<2x8x256xf32, #tpu.memory_space<vmem>>, vector<1x8x256xf32>,
    return
  }
}

</mosaic_0001>

<bundles_post_ra>
// kernel: _lambda_.1
= control target key start
LH: loop header
LB: loop body
LE: loop exit
PB: predicated region body
PF: predicated region fallthrough
CT: control target
= control target key end

     0   :  { %v1518_v0 = vmov 0.0   ;;  %vm73_vm0 = vcmask 1043456   ;;  %s1519_s25 = smov 16   ;;  %s1520_s26 = smov 17   ;;  %vm69_vm1 = vcmask 31744   ;;  %v1526_v10 = vmov 0   ;;  %s2081_s0 = inlined_call_operand.vmem [shape: f32[2,4,256], index: 0, kind: input, shape index: {}]   ;;  %s2082_s10 = inlined_call_operand.vmem [shape: f32[8,4], index: 10, kind: input, shape index: {}]   ;;  %s2083_s3 = inlined_call_operand.vmem [shape: f32[8,1], index: 3, kind: input, shape index: {}]   ;;  %s2084_s1 = inlined_call_operand.vmem [shape: f32[9,1,512], index: 1, kind: input, shape index: {}]   ;;  %s2085_s2 = inlined_call_operand.vmem [shape: f32[8,72], index: 2, kind: input, shape index: {}]   ;;  %s2086_s5 = inlined_call_operand.vmem [shape: f32[8,1], index: 5, kind: input, shape index: {}, may-alias: {5,9}]   ;;  %s2087_s4 = inlined_call_operand.vmem [shape: f32[8,1], index: 4, kind: input, shape index: {}, may-alias: {4,8}]   ;;  %s2088_s7 = inlined_call_operand.vmem [shape: f32[8,1], index: 7, kind: input, shape index: {}]   ;;  %s2089_s6 = inlined_call_operand.vmem [shape: f32[8,72], index: 6, kind: input, shape index: {}]   ;;  %s2090_s11 = inlined_call_operand.vmem [shape: f32[8,1], index: 11, kind: input, shape index: {}]   ;;  %s2091_s9 = inlined_call_operand.vmem [shape: f32[8,1], index: 9, kind: input, shape index: {}, may-alias: {5,9}]   ;;  %s2092_s8 = inlined_call_operand.vmem [shape: f32[8,1], index: 8, kind: input, shape index: {}, may-alias: {4,8}]   ;;  %s2093_s12 = inlined_call_operand.vmem [shape: f32[2,8,256], index: 12, kind: output, shape index: {}]  }
   0x1   :  { %41 = vst [vmem:[#allocation2] sm:$0xff] %v1518_v0  ;;  %v45_v1 = vld [vmem:[%s2081_s0] sm:$0xff]  ;;  %42 = vst [vmem:[#allocation2 + $0x8] sm:$0xff] %v1518_v0  ;;  %v1409_v2 = vld [vmem:[%s2081_s0 + $0x8] sm:$0xff]  ;;  %150 = vmatprep.mubr.f32.mxu0 %v1518_v0  ;;  %221 = vmatprep.mubr.f32.mxu1 %v1518_v0  ;;  %s1522_s28 = smov 1   ;;  %s1523_s29 = smov 127   ;;  %v236_v12 = vlaneseq }
   0x2   :  { %43 = vst [vmem:[#allocation2 + $0x10] sm:$0xff] %v1518_v0  ;;  %44 = vst [vmem:[#allocation2 + $0x18] sm:$0xff] %v1518_v0  ;;  %v47_v3 = vcombine.high %v45_v1, %v45_v1  ;;  %v54_v4 = vcombine.high %v1409_v2, %v1409_v2  ;;  %v62_v9 = vld [vmem:[%s2082_s10] sm:$0xff]  ;;  %s1521_s10 = smov 15   ;;  %s1524_s30 = smov 113   ;;  %1510 = vset.pattern.permute.xlu0 %v1526_v10  ;;  %1511 = vset.pattern.permute.xlu1 %v1526_v10  ;;  %vm628_vm10 = vcmask 588800  }
   0x3   :  { %49 = vst [vmem:[#allocation2] sm:$0xf] %v45_v1  ;;  %56 = vst [vmem:[#allocation2 + $0x10] sm:$0xf] %v1409_v2  ;;  %s1525_s13 = smov 112   ;;  %s1527_s14 = smov 111  }
   0x4   :  { %50 = vst [vmem:[#allocation2 + $0x8] sm:$0xf] %v47_v3  ;;  %57 = vst [vmem:[#allocation2 + $0x18] sm:$0xf] %v54_v4  ;;  %v622_v11 = vld [vmem:[%s2083_s3] sm:$0xff]  ;;  %v246_v13 = vshrl.u32 %v236_v12, 7 }
   0x5   :  { %v1689_v16 = vand.u32 127, %v236_v12  ;;  %v1416_v18 = vld [vmem:[%s2084_s1 + $0x4] sm:$0xf]  ;;  %v243_v19 = vld [vmem:[%s2084_s1] sm:$0xf] }
   0x6   :  { %v1691_v17 = vsub.s32 1, %v246_v13  ;;  %v1699_v22 = vsub.s32 0, %v246_v13  ;;  %v1701_v23 = vsub.s32 2, %v246_v13  ;;  %v1703_v24 = vsub.s32 3, %v246_v13  ;;  %v1417_v54 = vld [vmem:[%s2084_s1 + $0x8] sm:$0xf] }
   0x7   :  { %vm281_vm2 = vcmp.lt.s32.totalorder %v1689_v16, 16  ;;  %vm238_vm3 = vcmp.lt.s32.totalorder %v1689_v16, 17  ;;  %v1418_v55 = vld [vmem:[%s2084_s1 + $0xc] sm:$0xf]  ;;  %vm325_vm4 = vcmp.lt.s32.totalorder %v1689_v16, 15  ;;  %vm369_vm5 = vcmp.lt.s32.totalorder %v1689_v16, 1 }
   0x8   :  { %v296_v25 = vrot.slane %v1416_v18, %v1691_v17  ;;  %v252_v26 = vrot.slane %v243_v19, %v1691_v17  ;;  %v300_v27 = vrot.slane %v1416_v18, %v1701_v23  ;;  %v256_v29 = vrot.slane %v243_v19, %v1701_v23 }
   0x9   :  { %v292_v31 = vrot.slane %v1416_v18, %v1699_v22  ;;  %v304_v32 = vrot.slane %v1416_v18, %v1703_v24  ;;  %v248_v39 = vrot.slane %v243_v19, %v1699_v22  ;;  %v260_v40 = vrot.slane %v243_v19, %v1703_v24 }
   0xa   :  { %v1605_v5 = vld [vmem:[#allocation2] sm:$0xff]  ;;  %v1611_v6 = vld [vmem:[#allocation2 + $0x10] sm:$0xff]  ;;  %v340_v61 = vrot.slane %v1417_v54, %v1691_v17  ;;  %v384_v62 = vrot.slane %v1418_v55, %v1691_v17  ;;  %v380_v10 = vrot.slane %v1418_v55, %v1699_v22  ;;  %v388_v19 = vrot.slane %v1418_v55, %v1701_v23 }
   0xb   :  { %273 = vrot.lane.b32.xlu1 %v1605_v5, %s1519_s25  ;;  %228 = vrot.lane.b32.xlu0 %v1605_v5, %s1520_s26  ;;  %v1613_v7 = vld [vmem:[#allocation2 + $0x8] sm:$0xff]  ;;  %v1615_v8 = vld [vmem:[#allocation2 + $0x18] sm:$0xff]  ;;  %vm417_vm6 = vcmp.lt.s32.totalorder %v1689_v16, 127  ;;  %vm461_vm7 = vcmp.lt.s32.totalorder %v1689_v16, 113  ;;  %vm505_vm8 = vcmp.lt.s32.totalorder %v1689_v16, 112  ;;  %vm549_vm9 = vcmp.lt.s32.totalorder %v1689_v16, 111 }
   0xc   :  { %1410 = vmatprep.subr.msk.mxu0 %vm73_vm0, %v1613_v7  ;;  %1413 = vmatprep.subr.msk.mxu1 %vm73_vm0, %v1615_v8 }
   0xd   :  { %1411 = vmatpush1.msk.msra.mxu0 %vm73_vm0, %v1605_v5  ;;  %1414 = vmatpush1.msk.msra.mxu1 %vm73_vm0, %v1611_v6 }
   0xe   :  { %1412 = vmatmul.mubr.msk.f32.vlgmr.msra.gmra.mrb[0].mxu0 %vm69_vm1, %v62_v9  ;;  %1415 = vmatmul.mubr.msk.f32.vlgmr.msra.gmra.mrb[0].mxu1 %vm69_vm1, %v62_v9 }
   0xf   :  { %277 = vrot.lane.b32.xlu1 %v1611_v6, %s1519_s25  ;;  %232 = vrot.lane.b32.xlu0 %v1611_v6, %s1520_s26 }
  0x10   :  { %696 = vmatprep.mubr.f32.mxu0 %v1518_v0  ;;  %767 = vmatprep.mubr.f32.mxu1 %v1518_v0 }
  0x13   :  { %275 = vrot.lane.b32.xlu1 %v1613_v7, %s1519_s25  ;;  %230 = vrot.lane.b32.xlu0 %v1613_v7, %s1520_s26 }
  0x17   :  { %279 = vrot.lane.b32.xlu1 %v1615_v8, %s1519_s25  ;;  %234 = vrot.lane.b32.xlu0 %v1615_v8, %s1520_s26 }
  0x1b   :  { %319 = vrot.lane.b32.xlu1 %v1613_v7, %s1521_s10  ;;  %317 = vrot.lane.b32.xlu0 %v1605_v5, %s1521_s10 }
  0x1f   :  { %363 = vrot.lane.b32.xlu1 %v1613_v7, %s1522_s28  ;;  %361 = vrot.lane.b32.xlu0 %v1605_v5, %s1522_s28 }
  0x23   :  { %367 = vrot.lane.b32.xlu1 %v1615_v8, %s1522_s28  ;;  %323 = vrot.lane.b32.xlu0 %v1615_v8, %s1521_s10 }
  0x27   :  { %365 = vrot.lane.b32.xlu1 %v1611_v6, %s1522_s28  ;;  %321 = vrot.lane.b32.xlu0 %v1611_v6, %s1521_s10 }
  0x2b   :  { %413 = vrot.lane.b32.xlu1 %v1611_v6, %s1523_s29  ;;  %411 = vrot.lane.b32.xlu0 %v1613_v7, %s1523_s29 }
  0x2f   :  { %415 = vrot.lane.b32.xlu1 %v1615_v8, %s1523_s29  ;;  %409 = vrot.lane.b32.xlu0 %v1605_v5, %s1523_s29 }
  0x33   :  { %457 = vrot.lane.b32.xlu1 %v1611_v6, %s1524_s30  ;;  %455 = vrot.lane.b32.xlu0 %v1613_v7, %s1524_s30 }
  0x37   :  { %501 = vrot.lane.b32.xlu1 %v1611_v6, %s1525_s13  ;;  %499 = vrot.lane.b32.xlu0 %v1613_v7, %s1525_s13 }
  0x3b   :  { %497 = vrot.lane.b32.xlu1 %v1605_v5, %s1525_s13  ;;  %453 = vrot.lane.b32.xlu0 %v1605_v5, %s1524_s30 }
  0x3f   :  { %503 = vrot.lane.b32.xlu1 %v1615_v8, %s1525_s13  ;;  %459 = vrot.lane.b32.xlu0 %v1615_v8, %s1524_s30 }
  0x43   :  { %545 = vrot.lane.b32.xlu1 %v1611_v6, %s1527_s14  ;;  %543 = vrot.lane.b32.xlu0 %v1613_v7, %s1527_s14 }
  0x47   :  { %547 = vrot.lane.b32.xlu1 %v1615_v8, %s1527_s14  ;;  %541 = vrot.lane.b32.xlu0 %v1605_v5, %s1527_s14 }
  0x4b   :  { %625 = vperm.xlu0 %1510, %v622_v11   ;;  %v336_v11 = vrot.slane %v1417_v54, %v1699_v22 }
  0x7d   :  { %v274_v14 = vpop.permute.xlu1 %273  ;;  %v229_v15 = vpop.permute.xlu0 %228 }
  0x81   :  { %v278_v20 = vpop.permute.xlu1 %277  ;;  %v233_v21 = vpop.permute.xlu0 %232 }
  0x85   :  { %v276_v28 = vpop.permute.xlu1 %275  ;;  %v231_v30 = vpop.permute.xlu0 %230 }
  0x86   :  { %v283_v33 = vsel %vm281_vm2, %v276_v28, %v278_v20  ;;  %v284_v34 = vsel %vm281_vm2, %v274_v14, %v276_v28  ;;  %v240_v35 = vsel %vm238_vm3, %v231_v30, %v233_v21  ;;  %v241_v36 = vsel %vm238_vm3, %v229_v15, %v231_v30 }
  0x87   :  { %v310_v37 = vmul.f32 %v296_v25, %v284_v34  ;;  %v266_v38 = vmul.f32 %v252_v26, %v241_v36  ;;  %v311_v41 = vmul.f32 %v300_v27, %v283_v33  ;;  %v267_v42 = vmul.f32 %v256_v29, %v240_v35 }
  0x88   :  { %v344_v27 = vrot.slane %v1417_v54, %v1701_v23  ;;  %v348_v28 = vrot.slane %v1417_v54, %v1703_v24 }
  0x89   :  { %v280_v43 = vpop.permute.xlu1 %279  ;;  %v235_v44 = vpop.permute.xlu0 %234  ;;  %v1436_v45 = vpack.c.bf16 %v310_v37, %v266_v38  ;;  %v1454_v60 = vpack.c.bf16 %v311_v41, %v267_v42 }
  0x8a   :  { %v282_v46 = vsel %vm281_vm2, %v278_v20, %v280_v43  ;;  %v285_v47 = vsel %vm281_vm2, %v280_v43, %v274_v14  ;;  %v239_v48 = vsel %vm238_vm3, %v233_v21, %v235_v44  ;;  %v242_v49 = vsel %vm238_vm3, %v235_v44, %v229_v15  ;;  %v1419_v21 = vld [vmem:[%s2084_s1 + $0x14] sm:$0xf] }
  0x8b   :  { %v309_v50 = vmul.f32 %v292_v31, %v285_v47  ;;  %v312_v51 = vmul.f32 %v304_v32, %v282_v46  ;;  %v265_v52 = vmul.f32 %v248_v39, %v242_v49  ;;  %v268_v53 = vmul.f32 %v260_v40, %v239_v48  ;;  %1437 = vmatprep.subr.bf16.mxu0 %v1436_v45 }
  0x8c   :  { %v392_v20 = vrot.slane %v1418_v55, %v1703_v24  ;;  %v432_v32 = vrot.slane %v1419_v21, %v1691_v17  ;;  %v436_v47 = vrot.slane %v1419_v21, %v1701_v23  ;;  %v428_v48 = vrot.slane %v1419_v21, %v1699_v22 }
  0x8d   :  { %v1438_v56 = vpack.c.bf16 %v309_v50, %v265_v52  ;;  %v320_v57 = vpop.permute.xlu1 %319  ;;  %v318_v58 = vpop.permute.xlu0 %317  ;;  %v1452_v59 = vpack.c.bf16 %v312_v51, %v268_v53  ;;  %v440_v49 = vrot.slane %v1419_v21, %v1703_v24 }
  0x8e   :  { %v328_v63 = vsel %vm325_vm4, %v318_v58, %v320_v57 }
  0x8f   :  { %1439 = vmatpush1.bf16.msra.mxu0 %v1438_v56  ;;  %1453 = vmatprep.subr.bf16.mxu1 %v1452_v59  ;;  %v354_v4 = vmul.f32 %v340_v61, %v328_v63  ;;  %v1420_v59 = vld [vmem:[%s2084_s1 + $0x18] sm:$0xf] }
  0x90   :  { %1455 = vmatpush1.bf16.msra.mxu1 %v1454_v60 }
  0x91   :  { %v364_v1 = vpop.permute.xlu1 %363  ;;  %v362_v2 = vpop.permute.xlu0 %361 }
  0x92   :  { %v372_v3 = vsel %vm369_vm5, %v362_v2, %v364_v1 }
  0x93   :  { %v398_v9 = vmul.f32 %v384_v62, %v372_v3 }
  0x95   :  { %v368_v12 = vpop.permute.xlu1 %367  ;;  %v324_v13 = vpop.permute.xlu0 %323  ;;  %v1440_v14 = vpack.c.bf16 %v398_v9, %v354_v4 }
  0x96   :  { %v373_v15 = vsel %vm369_vm5, %v368_v12, %v362_v2  ;;  %v329_v18 = vsel %vm325_vm4, %v324_v13, %v318_v58  ;;  %v476_v2 = vrot.slane %v1420_v59, %v1691_v17 }
  0x97   :  { %v397_v25 = vmul.f32 %v380_v10, %v373_v15  ;;  %v353_v26 = vmul.f32 %v336_v11, %v329_v18  ;;  %1441 = vmatprep.subr.bf16.mxu0 %v1440_v14 }
  0x99   :  { %v1442_v29 = vpack.c.bf16 %v397_v25, %v353_v26  ;;  %v366_v30 = vpop.permute.xlu1 %365  ;;  %v322_v31 = vpop.permute.xlu0 %321  ;;  %v1422_v25 = vld [vmem:[%s2084_s1 + $0x20] sm:$0xf] }
  0x9a   :  { %v370_v33 = vsel %vm369_vm5, %v366_v30, %v368_v12  ;;  %v371_v34 = vsel %vm369_vm5, %v364_v1, %v366_v30  ;;  %v326_v35 = vsel %vm325_vm4, %v322_v31, %v324_v13  ;;  %v327_v36 = vsel %vm325_vm4, %v320_v57, %v322_v31 }
  0x9b   :  { %v399_v37 = vmul.f32 %v388_v19, %v371_v34  ;;  %v400_v38 = vmul.f32 %v392_v20, %v370_v33  ;;  %v355_v39 = vmul.f32 %v344_v27, %v327_v36  ;;  %v356_v40 = vmul.f32 %v348_v28, %v326_v35  ;;  %1443 = vmatpush1.bf16.msra.mxu0 %v1442_v29 }
  0x9c   :  { %v472_v12 = vrot.slane %v1420_v59, %v1699_v22  ;;  %v480_v28 = vrot.slane %v1420_v59, %v1701_v23  ;;  %v484_v29 = vrot.slane %v1420_v59, %v1703_v24  ;;  %v564_v33 = vrot.slane %v1422_v25, %v1691_v17  ;;  %v585_v59 = vld [vmem:[%s2085_s2] sm:$0xff] }
  0x9d   :  { %v1458_v41 = vpack.c.bf16 %v399_v37, %v355_v39  ;;  %v414_v42 = vpop.permute.xlu1 %413  ;;  %v412_v43 = vpop.permute.xlu0 %411  ;;  %v1456_v44 = vpack.c.bf16 %v400_v38, %v356_v40 }
  0x9e   :  { %v419_v45 = vsel %vm417_vm6, %v412_v43, %v414_v42 }
  0x9f   :  { %v446_v46 = vmul.f32 %v432_v32, %v419_v45  ;;  %1457 = vmatprep.subr.bf16.mxu1 %v1456_v44 }
  0xa0   :  { %1459 = vmatpush1.bf16.msra.mxu1 %v1458_v41 }
  0xa1   :  { %v416_v50 = vpop.permute.xlu1 %415  ;;  %v410_v51 = vpop.permute.xlu0 %409  ;;  %v1444_v52 = vpack.c.bf16 %v446_v46, %v1613_v7  ;;  %v1421_v7 = vld [vmem:[%s2084_s1 + $0x1c] sm:$0xf] }
  0xa2   :  { %v418_v53 = vsel %vm417_vm6, %v414_v42, %v416_v50  ;;  %v420_v54 = vsel %vm417_vm6, %v410_v51, %v412_v43  ;;  %v421_v55 = vsel %vm417_vm6, %v416_v50, %v410_v51  ;;  %v520_v3 = vrot.slane %v1421_v7, %v1691_v17 }
  0xa3   :  { %v447_v56 = vmul.f32 %v436_v47, %v418_v53  ;;  %v445_v57 = vmul.f32 %v428_v48, %v420_v54  ;;  %v448_v58 = vmul.f32 %v440_v49, %v421_v55  ;;  %1445 = vmatprep.subr.bf16.mxu0 %v1444_v52  ;;  %v524_v20 = vrot.slane %v1421_v7, %v1701_v23 }
  0xa4   :  { %v528_v21 = vrot.slane %v1421_v7, %v1703_v24  ;;  %v568_v48 = vrot.slane %v1422_v25, %v1701_v23  ;;  %v560_v49 = vrot.slane %v1422_v25, %v1699_v22  ;;  %v572_v50 = vrot.slane %v1422_v25, %v1703_v24 }
  0xa5   :  { %v1462_v60 = vpack.c.bf16 %v447_v56, %v1611_v6  ;;  %v1446_v61 = vpack.c.bf16 %v445_v57, %v1605_v5  ;;  %v458_v62 = vpop.permute.xlu1 %457  ;;  %v456_v63 = vpop.permute.xlu0 %455  ;;  %v1460_v1 = vpack.c.bf16 %v448_v58, %v1615_v8  ;;  %v516_v8 = vrot.slane %v1421_v7, %v1699_v22 }
  0xa6   :  { %v463_v4 = vsel %vm461_vm7, %v456_v63, %v458_v62 }
  0xa7   :  { %1447 = vmatpush1.bf16.msra.mxu0 %v1446_v61  ;;  %1461 = vmatprep.subr.bf16.mxu1 %v1460_v1  ;;  %v490_v10 = vmul.f32 %v476_v2, %v463_v4 }
  0xa8   :  { %1463 = vmatpush1.bf16.msra.mxu1 %v1462_v60 }
  0xa9   :  { %v502_v6 = vpop.permute.xlu1 %501  ;;  %v500_v5 = vpop.permute.xlu0 %499 }
  0xaa   :  { %v507_v9 = vsel %vm505_vm8, %v500_v5, %v502_v6 }
  0xab   :  { %v534_v11 = vmul.f32 %v520_v3, %v507_v9 }
  0xad   :  { %v498_v13 = vpop.permute.xlu1 %497  ;;  %v454_v14 = vpop.permute.xlu0 %453  ;;  %v1448_v15 = vpack.c.bf16 %v534_v11, %v490_v10 }
  0xae   :  { %v508_v18 = vsel %vm505_vm8, %v498_v13, %v500_v5  ;;  %v464_v19 = vsel %vm461_vm7, %v454_v14, %v456_v63 }
  0xaf   :  { %v533_v26 = vmul.f32 %v516_v8, %v508_v18  ;;  %v489_v27 = vmul.f32 %v472_v12, %v464_v19  ;;  %1449 = vmatprep.subr.bf16.mxu0 %v1448_v15 }
  0xb1   :  { %v1450_v30 = vpack.c.bf16 %v533_v26, %v489_v27  ;;  %v504_v31 = vpop.permute.xlu1 %503  ;;  %v460_v32 = vpop.permute.xlu0 %459 }
  0xb2   :  { %v506_v34 = vsel %vm505_vm8, %v502_v6, %v504_v31  ;;  %v509_v35 = vsel %vm505_vm8, %v504_v31, %v498_v13  ;;  %v462_v36 = vsel %vm461_vm7, %v458_v62, %v460_v32  ;;  %v465_v37 = vsel %vm461_vm7, %v460_v32, %v454_v14 }
  0xb3   :  { %v535_v38 = vmul.f32 %v524_v20, %v506_v34  ;;  %v536_v39 = vmul.f32 %v528_v21, %v509_v35  ;;  %v491_v40 = vmul.f32 %v480_v28, %v462_v36  ;;  %v492_v41 = vmul.f32 %v484_v29, %v465_v37  ;;  %1451 = vmatpush1.bf16.msra.mxu0 %v1450_v30  ;;  %v775_v30 = vld [vmem:[%s2086_s5] sm:$0xff] }
  0xb4   :  { %v774_v34 = vld [vmem:[%s2087_s4] sm:$0xff] }
  0xb5   :  { %v1466_v42 = vpack.c.bf16 %v535_v38, %v491_v40  ;;  %v546_v43 = vpop.permute.xlu1 %545  ;;  %v544_v44 = vpop.permute.xlu0 %543  ;;  %v1464_v45 = vpack.c.bf16 %v536_v39, %v492_v41 }
  0xb6   :  { %v551_v46 = vsel %vm549_vm9, %v544_v44, %v546_v43 }
  0xb7   :  { %v578_v47 = vmul.f32 %v564_v33, %v551_v46  ;;  %1465 = vmatprep.subr.bf16.mxu1 %v1464_v45 }
  0xb8   :  { %1467 = vmatpush1.bf16.msra.mxu1 %v1466_v42 }
  0xb9   :  { %v548_v51 = vpop.permute.xlu1 %547  ;;  %v542_v52 = vpop.permute.xlu0 %541  ;;  %648 = vmatprep.subr.mxu0 %v578_v47 }
  0xba   :  { %v550_v53 = vsel %vm549_vm9, %v546_v43, %v548_v51  ;;  %v552_v54 = vsel %vm549_vm9, %v542_v52, %v544_v44  ;;  %v553_v55 = vsel %vm549_vm9, %v548_v51, %v542_v52  ;;  %v1198_v51 = vld [vmem:[%s2088_s7] sm:$0xff] }
  0xbb   :  { %v579_v56 = vmul.f32 %v568_v48, %v550_v53  ;;  %v577_v57 = vmul.f32 %v560_v49, %v552_v54  ;;  %v580_v58 = vmul.f32 %v572_v50, %v553_v55  ;;  %v833_v54 = vld [vmem:[%s2084_s1] sm:$0xf]  ;;  %v1425_v55 = vld [vmem:[%s2084_s1 + $0x4] sm:$0xf] }
  0xbd   :  { %649 = vmatpush1.msra.mxu0 %v577_v57  ;;  %719 = vmatprep.subr.mxu1 %v580_v58  ;;  %v842_v58 = vrot.slane %v833_v54, %v1691_v17 }
  0xbe   :  { %1423 = vmatmul.mubr.msk.f32.vlgmr.msra.gmra.mrb[2].mxu0 %vm628_vm10, %v585_v59  ;;  %720 = vmatpush1.msra.mxu1 %v579_v56 }
  0xbf   :  { %1424 = vmatmul.mubr.msk.f32.vlgmr.msra.gmra.mrb[2].mxu1 %vm628_vm10, %v585_v59  ;;  %1271 = vmatprep.mubr.f32.mxu0 %v1518_v0  ;;  %v884_v59 = vrot.slane %v1425_v55, %v1691_v17 }
  0xc0   :  { %1342 = vmatprep.mubr.f32.mxu1 %v1518_v0 }
  0xca   :  { %v626_v63 = vpop.permute.xlu0 %625 }
  0xe1   :  { %v1838_v7 = vpop.f32.mrb[0].mxu0  ;;  %v1840_v60 = vpop.f32.mrb[0].mxu1 }
  0xe2   :  { %v1842_v61 = vpop.f32.mrb[1].mxu0  ;;  %v1844_v62 = vpop.f32.mrb[1].mxu1 }
 0x191   :  { %v698_v1 = vpop.f32.mrb[2].mxu0 }
 0x192   :  { %v699_v2 = vadd.f32 %v698_v1, %v626_v63  ;;  %v700_v3 = vpop.f32.mrb[3].mxu0  ;;  %v769_v4 = vpop.f32.mrb[2].mxu1 }
 0x193   :  { %v701_v6 = vadd.f32 %v700_v3, %v626_v63  ;;  %v771_v5 = vpop.f32.mrb[3].mxu1  ;;  %v770_v10 = vadd.f32 %v769_v4, %v626_v63  ;;  %v838_v4 = vrot.slane %v833_v54, %v1699_v22 }
 0x194   :  { %v772_v8 = vadd.f32 %v771_v5, %v626_v63 }
 0x195   :  { %v776_v9 = vadd.f32 %v701_v6, %v699_v2 }
 0x197   :  { %v777_v11 = vadd.f32 %v776_v9, %v770_v10  ;;  %v880_v9 = vrot.slane %v1425_v55, %v1699_v22 }
 0x199   :  { %v778_v0 = vadd.f32 %v777_v11, %v772_v8 }
 0x19b   :  { %779 = vadd.xlane.f32.xlu1 %v778_v0 }
 0x228   :  { %v780_v12 = vpop.xlane.xlu1 %779 }
 0x229   :  { %v781_v13 = vmul.f32 0.001953125, %v780_v12  ;;  %v846_v12 = vrot.slane %v833_v54, %v1701_v23 }
 0x22b   :  { %v782_v14 = vsub.f32 %v699_v2, %v781_v13  ;;  %v783_v15 = vsub.f32 %v701_v6, %v781_v13  ;;  %v784_v18 = vsub.f32 %v770_v10, %v781_v13  ;;  %v785_v19 = vsub.f32 %v772_v8, %v781_v13 }
 0x22c   :  { %v850_v13 = vrot.slane %v833_v54, %v1703_v24 }
 0x22d   :  { %v786_v20 = vmul.f32 %v782_v14, %v782_v14  ;;  %v787_v21 = vmul.f32 %v783_v15, %v783_v15  ;;  %v788_v25 = vmul.f32 %v784_v18, %v784_v18  ;;  %v789_v27 = vmul.f32 %v785_v19, %v785_v19 }
 0x22f   :  { %v790_v26 = vadd.f32 %v787_v21, %v786_v20  ;;  %v892_v20 = vrot.slane %v1425_v55, %v1703_v24 }
 0x231   :  { %v791_v28 = vadd.f32 %v790_v26, %v788_v25 }
 0x233   :  { %v792_v29 = vadd.f32 %v791_v28, %v789_v27 }
 0x235   :  { %793 = vadd.xlane.f32.xlu0 %v792_v29 }
 0x24b   :  { %810 = vperm.xlu0 %1510, %v775_v30  }
 0x2c2   :  { %v794_v31 = vpop.xlane.xlu0 %793 }
 0x2c3   :  { %v795_v32 = vmul.f32 0.001953125, %v794_v31 }
 0x2c5   :  { %v796_v33 = vadd.f32 1e-05, %v795_v32 }
 0x2c7   :  { %1514 = vrsqrt.f32 %v796_v33 }
 0x2ca   :  { %v811_v41 = vpop.permute.xlu0 %810 }
 0x2d1   :  { %v1515_v35 = vpop.eup %1514 }
 0x2d2   :  { %v798_v36 = vmul.f32 %v1515_v35, %v774_v34  ;;  %v1426_v35 = vld [vmem:[%s2084_s1 + $0x8] sm:$0xf] }
 0x2d4   :  { %801 = vperm.xlu1 %1511, %v798_v36   ;;  %v1427_v36 = vld [vmem:[%s2084_s1 + $0xc] sm:$0xf] }
 0x2d5   :  { %v964_v54 = vrot.slane %v1427_v36, %v1699_v22 }
 0x353   :  { %v802_v37 = vpop.permute.xlu1 %801 }
 0x354   :  { %v804_v38 = vmul.f32 %v802_v37, %v782_v14  ;;  %v805_v39 = vmul.f32 %v802_v37, %v783_v15  ;;  %v807_v40 = vmul.f32 %v802_v37, %v785_v19  ;;  %v806_v43 = vmul.f32 %v802_v37, %v784_v18 }
 0x355   :  { %v888_v19 = vrot.slane %v1425_v55, %v1701_v23 }
 0x356   :  { %v813_v42 = vadd.f32 %v811_v41, %v804_v38  ;;  %v814_v44 = vadd.f32 %v811_v41, %v805_v39  ;;  %v816_v45 = vadd.f32 %v811_v41, %v807_v40  ;;  %v815_v47 = vadd.f32 %v811_v41, %v806_v43 }
 0x357   :  { %v926_v41 = vrot.slane %v1426_v35, %v1691_v17 }
 0x358   :  { %v1852_v46 = vmax.f32 %v813_v42, 0.0  ;;  %v1858_v48 = vmax.f32 %v814_v44, 0.0  ;;  %v1860_v49 = vmax.f32 %v816_v45, 0.0  ;;  %v1866_v50 = vmax.f32 %v815_v47, 0.0 }
 0x359   :  { %v968_v42 = vrot.slane %v1427_v36, %v1691_v17 }
 0x35a   :  { %863 = vrot.lane.b32.xlu0 %v1852_v46, %s1519_s25  ;;  %821 = vrot.lane.b32.xlu1 %v1852_v46, %s1520_s26 }
 0x35e   :  { %827 = vrot.lane.b32.xlu0 %v1860_v49, %s1520_s26  ;;  %823 = vrot.lane.b32.xlu1 %v1858_v48, %s1520_s26 }
 0x362   :  { %825 = vrot.lane.b32.xlu0 %v1866_v50, %s1520_s26  ;;  %865 = vrot.lane.b32.xlu1 %v1858_v48, %s1519_s25 }
 0x366   :  { %905 = vrot.lane.b32.xlu0 %v1852_v46, %s1521_s10  ;;  %869 = vrot.lane.b32.xlu1 %v1860_v49, %s1519_s25 }
 0x36a   :  { %947 = vrot.lane.b32.xlu0 %v1852_v46, %s1522_s28  ;;  %867 = vrot.lane.b32.xlu1 %v1866_v50, %s1519_s25 }
 0x36e   :  { %911 = vrot.lane.b32.xlu0 %v1860_v49, %s1521_s10  ;;  %907 = vrot.lane.b32.xlu1 %v1858_v48, %s1521_s10 }
 0x372   :  { %909 = vrot.lane.b32.xlu0 %v1866_v50, %s1521_s10  ;;  %949 = vrot.lane.b32.xlu1 %v1858_v48, %s1522_s28 }
 0x376   :  { %995 = vrot.lane.b32.xlu0 %v1858_v48, %s1523_s29  ;;  %953 = vrot.lane.b32.xlu1 %v1860_v49, %s1522_s28 }
 0x37a   :  { %993 = vrot.lane.b32.xlu0 %v1852_v46, %s1523_s29  ;;  %951 = vrot.lane.b32.xlu1 %v1866_v50, %s1522_s28 }
 0x37e   :  { %1037 = vrot.lane.b32.xlu0 %v1858_v48, %s1524_s30  ;;  %997 = vrot.lane.b32.xlu1 %v1866_v50, %s1523_s29 }
 0x382   :  { %1079 = vrot.lane.b32.xlu0 %v1858_v48, %s1525_s13  ;;  %999 = vrot.lane.b32.xlu1 %v1860_v49, %s1523_s29 }
 0x386   :  { %1035 = vrot.lane.b32.xlu0 %v1852_v46, %s1524_s30  ;;  %1039 = vrot.lane.b32.xlu1 %v1866_v50, %s1524_s30 }
 0x38a   :  { %1041 = vrot.lane.b32.xlu0 %v1860_v49, %s1524_s30  ;;  %1081 = vrot.lane.b32.xlu1 %v1866_v50, %s1525_s13 }
 0x38e   :  { %1121 = vrot.lane.b32.xlu0 %v1858_v48, %s1527_s14  ;;  %1077 = vrot.lane.b32.xlu1 %v1852_v46, %s1525_s13 }
 0x392   :  { %1119 = vrot.lane.b32.xlu0 %v1852_v46, %s1527_s14  ;;  %1083 = vrot.lane.b32.xlu1 %v1860_v49, %s1525_s13 }
 0x396   :  { %1201 = vperm.xlu0 %1510, %v1198_v51   ;;  %1123 = vrot.lane.b32.xlu1 %v1866_v50, %s1527_s14  ;;  %v922_v51 = vrot.slane %v1426_v35, %v1699_v22 }
 0x39a   :  { %1125 = vrot.lane.b32.xlu1 %v1860_v49, %s1527_s14 }
 0x3cc   :  { %v864_v52 = vpop.permute.xlu0 %863  ;;  %v822_v53 = vpop.permute.xlu1 %821 }
 0x3d0   :  { %v828_v56 = vpop.permute.xlu0 %827  ;;  %v824_v57 = vpop.permute.xlu1 %823 }
 0x3d1   :  { %v831_v63 = vsel %vm238_vm3, %v822_v53, %v824_v57  ;;  %v832_v10 = vsel %vm238_vm3, %v828_v56, %v822_v53 }
 0x3d2   :  { %v856_v6 = vmul.f32 %v842_v58, %v831_v63  ;;  %v855_v15 = vmul.f32 %v838_v4, %v832_v10  ;;  %v934_v63 = vrot.slane %v1426_v35, %v1703_v24 }
 0x3d4   :  { %v826_v1 = vpop.permute.xlu0 %825  ;;  %v866_v2 = vpop.permute.xlu1 %865 }
 0x3d5   :  { %v873_v3 = vsel %vm281_vm2, %v864_v52, %v866_v2  ;;  %v829_v21 = vsel %vm238_vm3, %v826_v1, %v828_v56  ;;  %v830_v25 = vsel %vm238_vm3, %v824_v57, %v826_v1 }
 0x3d6   :  { %v898_v5 = vmul.f32 %v884_v59, %v873_v3  ;;  %v857_v31 = vmul.f32 %v846_v12, %v830_v25  ;;  %v858_v32 = vmul.f32 %v850_v13, %v829_v21  ;;  %v930_v59 = vrot.slane %v1426_v35, %v1701_v23 }
 0x3d7   :  { %v972_v3 = vrot.slane %v1427_v36, %v1701_v23 }
 0x3d8   :  { %v906_v11 = vpop.permute.xlu0 %905  ;;  %v870_v8 = vpop.permute.xlu1 %869  ;;  %v1468_v0 = vpack.c.bf16 %v898_v5, %v856_v6 }
 0x3d9   :  { %v874_v14 = vsel %vm281_vm2, %v870_v8, %v864_v52 }
 0x3da   :  { %v897_v18 = vmul.f32 %v880_v9, %v874_v14  ;;  %1469 = vmatprep.subr.bf16.mxu0 %v1468_v0  ;;  %v976_v9 = vrot.slane %v1427_v36, %v1703_v24 }
 0x3dc   :  { %v1470_v26 = vpack.c.bf16 %v897_v18, %v855_v15  ;;  %v948_v27 = vpop.permute.xlu0 %947  ;;  %v868_v28 = vpop.permute.xlu1 %867 }
 0x3dd   :  { %v871_v29 = vsel %vm281_vm2, %v868_v28, %v870_v8  ;;  %v872_v30 = vsel %vm281_vm2, %v866_v2, %v868_v28  ;;  %v1428_v2 = vld [vmem:[%s2084_s1 + $0x14] sm:$0xf] }
 0x3de   :  { %v899_v33 = vmul.f32 %v888_v19, %v872_v30  ;;  %v900_v34 = vmul.f32 %v892_v20, %v871_v29  ;;  %1471 = vmatpush1.bf16.msra.mxu0 %v1470_v26  ;;  %v1010_v8 = vrot.slane %v1428_v2, %v1699_v22  ;;  %v1014_v18 = vrot.slane %v1428_v2, %v1691_v17 }
 0x3e0   :  { %v1486_v37 = vpack.c.bf16 %v899_v33, %v857_v31  ;;  %v912_v38 = vpop.permute.xlu0 %911  ;;  %v908_v39 = vpop.permute.xlu1 %907  ;;  %v1484_v40 = vpack.c.bf16 %v900_v34, %v858_v32  ;;  %v1018_v33 = vrot.slane %v1428_v2, %v1701_v23  ;;  %v1022_v34 = vrot.slane %v1428_v2, %v1703_v24 }
 0x3e1   :  { %v915_v43 = vsel %vm325_vm4, %v906_v11, %v908_v39  ;;  %v916_v55 = vsel %vm325_vm4, %v912_v38, %v906_v11 }
 0x3e2   :  { %1485 = vmatprep.subr.bf16.mxu1 %v1484_v40  ;;  %v940_v52 = vmul.f32 %v926_v41, %v915_v43  ;;  %v939_v4 = vmul.f32 %v922_v51, %v916_v55  ;;  %v1429_v43 = vld [vmem:[%s2084_s1 + $0x18] sm:$0xf] }
 0x3e3   :  { %1487 = vmatpush1.bf16.msra.mxu1 %v1486_v37  ;;  %v1056_v51 = vrot.slane %v1429_v43, %v1691_v17 }
 0x3e4   :  { %v910_v44 = vpop.permute.xlu0 %909  ;;  %v950_v45 = vpop.permute.xlu1 %949 }
 0x3e5   :  { %v957_v47 = vsel %vm369_vm5, %v948_v27, %v950_v45  ;;  %v914_v6 = vsel %vm325_vm4, %v908_v39, %v910_v44  ;;  %v913_v10 = vsel %vm325_vm4, %v910_v44, %v912_v38 }
 0x3e6   :  { %v982_v53 = vmul.f32 %v968_v42, %v957_v47  ;;  %v941_v13 = vmul.f32 %v930_v59, %v914_v6  ;;  %v942_v19 = vmul.f32 %v934_v63, %v913_v10 }
 0x3e8   :  { %v996_v56 = vpop.permute.xlu0 %995  ;;  %v954_v57 = vpop.permute.xlu1 %953  ;;  %v1472_v58 = vpack.c.bf16 %v982_v53, %v940_v52 }
 0x3e9   :  { %v958_v1 = vsel %vm369_vm5, %v954_v57, %v948_v27 }
 0x3ea   :  { %v981_v5 = vmul.f32 %v964_v54, %v958_v1  ;;  %1473 = vmatprep.subr.bf16.mxu0 %v1472_v58 }
 0x3ec   :  { %v1474_v11 = vpack.c.bf16 %v981_v5, %v939_v4  ;;  %v994_v0 = vpop.permute.xlu0 %993  ;;  %v952_v12 = vpop.permute.xlu1 %951  ;;  %v1064_v4 = vrot.slane %v1429_v43, %v1703_v24 }
 0x3ed   :  { %v955_v14 = vsel %vm369_vm5, %v952_v12, %v954_v57  ;;  %v956_v15 = vsel %vm369_vm5, %v950_v45, %v952_v12  ;;  %v1003_v20 = vsel %vm417_vm6, %v994_v0, %v996_v56 }
 0x3ee   :  { %v983_v21 = vmul.f32 %v972_v3, %v956_v15  ;;  %v984_v25 = vmul.f32 %v976_v9, %v955_v14  ;;  %1475 = vmatpush1.bf16.msra.mxu0 %v1474_v11  ;;  %v1027_v30 = vmul.f32 %v1010_v8, %v1003_v20  ;;  %v1060_v3 = vrot.slane %v1429_v43, %v1701_v23 }
 0x3f0   :  { %v1490_v26 = vpack.c.bf16 %v983_v21, %v941_v13  ;;  %v1038_v27 = vpop.permute.xlu0 %1037  ;;  %v998_v28 = vpop.permute.xlu1 %997  ;;  %v1488_v29 = vpack.c.bf16 %v984_v25, %v942_v19  ;;  %v1478_v38 = vpack.c.bf16 %v1027_v30, %v1852_v46  ;;  %v1431_v13 = vld [vmem:[%s2084_s1 + $0x20] sm:$0xf] }
 0x3f1   :  { %v1002_v31 = vsel %vm417_vm6, %v996_v56, %v998_v28  ;;  %v1140_v20 = vrot.slane %v1431_v13, %v1691_v17 }
 0x3f2   :  { %v1028_v32 = vmul.f32 %v1014_v18, %v1002_v31  ;;  %1489 = vmatprep.subr.bf16.mxu1 %v1488_v29 }
 0x3f3   :  { %1491 = vmatpush1.bf16.msra.mxu1 %v1490_v26 }
 0x3f4   :  { %v1080_v35 = vpop.permute.xlu0 %1079  ;;  %v1000_v36 = vpop.permute.xlu1 %999  ;;  %v1476_v37 = vpack.c.bf16 %v1028_v32, %v1858_v48  ;;  %v1430_v48 = vld [vmem:[%s2084_s1 + $0x1c] sm:$0xf] }
 0x3f5   :  { %v1001_v39 = vsel %vm417_vm6, %v998_v28, %v1000_v36  ;;  %v1004_v40 = vsel %vm417_vm6, %v1000_v36, %v994_v0  ;;  %v1098_v52 = vrot.slane %v1430_v48, %v1691_v17  ;;  %v1102_v10 = vrot.slane %v1430_v48, %v1701_v23 }
 0x3f6   :  { %v1029_v41 = vmul.f32 %v1018_v33, %v1001_v39  ;;  %v1030_v42 = vmul.f32 %v1022_v34, %v1004_v40  ;;  %1477 = vmatprep.subr.bf16.mxu0 %v1476_v37  ;;  %v1106_v11 = vrot.slane %v1430_v48, %v1703_v24  ;;  %v1136_v28 = vrot.slane %v1431_v13, %v1699_v22 }
 0x3f7   :  { %1479 = vmatpush1.bf16.msra.mxu0 %v1478_v38  ;;  %v1144_v17 = vrot.slane %v1431_v13, %v1701_v23 }
 0x3f8   :  { %v1494_v46 = vpack.c.bf16 %v1029_v41, %v1866_v50  ;;  %v1036_v44 = vpop.permute.xlu0 %1035  ;;  %v1040_v45 = vpop.permute.xlu1 %1039  ;;  %v1492_v47 = vpack.c.bf16 %v1030_v42, %v1860_v49  ;;  %v1052_v50 = vrot.slane %v1429_v43, %v1699_v22  ;;  %v1094_v49 = vrot.slane %v1430_v48, %v1699_v22  ;;  %v1161_v22 = vld [vmem:[%s2089_s6] sm:$0xff] }
 0x3f9   :  { %v1044_v53 = vsel %vm461_vm7, %v1038_v27, %v1040_v45  ;;  %v1045_v59 = vsel %vm461_vm7, %v1036_v44, %v1038_v27 }
 0x3fa   :  { %1493 = vmatprep.subr.bf16.mxu1 %v1492_v47  ;;  %v1070_v57 = vmul.f32 %v1056_v51, %v1044_v53  ;;  %v1069_v5 = vmul.f32 %v1052_v50, %v1045_v59  ;;  %v63_v53 = vld [vmem:[%s2090_s11] sm:$0xff] }
 0x3fb   :  { %1495 = vmatpush1.bf16.msra.mxu1 %v1494_v46 }
 0x3fc   :  { %v1042_v54 = vpop.permute.xlu0 %1041  ;;  %v1082_v55 = vpop.permute.xlu1 %1081 }
 0x3fd   :  { %v1086_v56 = vsel %vm505_vm8, %v1080_v35, %v1082_v55  ;;  %v1043_v8 = vsel %vm461_vm7, %v1040_v45, %v1042_v54  ;;  %v1046_v0 = vsel %vm461_vm7, %v1042_v54, %v1036_v44  ;;  %v1350_v54 = vld [vmem:[%s2091_s9] sm:$0xff] }
 0x3fe   :  { %v1112_v58 = vmul.f32 %v1098_v52, %v1086_v56  ;;  %v1071_v21 = vmul.f32 %v1060_v3, %v1043_v8  ;;  %v1072_v25 = vmul.f32 %v1064_v4, %v1046_v0 }
 0x400   :  { %v1122_v63 = vpop.permute.xlu0 %1121  ;;  %v1078_v1 = vpop.permute.xlu1 %1077  ;;  %v1480_v2 = vpack.c.bf16 %v1112_v58, %v1070_v57 }
 0x401   :  { %v1087_v6 = vsel %vm505_vm8, %v1078_v1, %v1080_v35  ;;  %v1148_v35 = vrot.slane %v1431_v13, %v1703_v24 }
 0x402   :  { %v1111_v9 = vmul.f32 %v1094_v49, %v1087_v6  ;;  %1481 = vmatprep.subr.bf16.mxu0 %v1480_v2 }
 0x404   :  { %v1482_v12 = vpack.c.bf16 %v1111_v9, %v1069_v5  ;;  %v1084_v14 = vpop.permute.xlu1 %1083  ;;  %v1120_v15 = vpop.permute.xlu0 %1119 }
 0x405   :  { %v1085_v18 = vsel %vm505_vm8, %v1082_v55, %v1084_v14  ;;  %v1088_v19 = vsel %vm505_vm8, %v1084_v14, %v1078_v1  ;;  %v1129_v29 = vsel %vm549_vm9, %v1120_v15, %v1122_v63 }
 0x406   :  { %v1113_v26 = vmul.f32 %v1102_v10, %v1085_v18  ;;  %v1114_v27 = vmul.f32 %v1106_v11, %v1088_v19  ;;  %1483 = vmatpush1.bf16.msra.mxu0 %v1482_v12  ;;  %v1153_v36 = vmul.f32 %v1136_v28, %v1129_v29  ;;  %v1349_v11 = vld [vmem:[%s2092_s8] sm:$0xff] }
 0x408   :  { %v1498_v30 = vpack.c.bf16 %v1113_v26, %v1071_v21  ;;  %v1124_v31 = vpop.permute.xlu1 %1123  ;;  %v1496_v32 = vpack.c.bf16 %v1114_v27, %v1072_v25 }
 0x409   :  { %v1128_v33 = vsel %vm549_vm9, %v1122_v63, %v1124_v31 }
 0x40a   :  { %v1154_v34 = vmul.f32 %v1140_v20, %v1128_v33  ;;  %1497 = vmatprep.subr.bf16.mxu1 %v1496_v32 }
 0x40b   :  { %1499 = vmatpush1.bf16.msra.mxu1 %v1498_v30 }
 0x40c   :  { %1223 = vmatprep.subr.mxu0 %v1154_v34  ;;  %v1126_v37 = vpop.permute.xlu1 %1125 }
 0x40d   :  { %v1127_v38 = vsel %vm549_vm9, %v1124_v31, %v1126_v37  ;;  %v1130_v39 = vsel %vm549_vm9, %v1126_v37, %v1120_v15  ;;  %1224 = vmatpush1.msra.mxu0 %v1153_v36 }
 0x40e   :  { %v1155_v40 = vmul.f32 %v1144_v17, %v1127_v38  ;;  %v1156_v41 = vmul.f32 %v1148_v35, %v1130_v39  ;;  %1432 = vmatmul.mubr.msk.f32.vlgmr.msra.gmra.mrb[4].mxu0 %vm628_vm10, %v1161_v22 }
 0x410   :  { %1294 = vmatprep.subr.mxu1 %v1156_v41 }
 0x411   :  { %1295 = vmatpush1.msra.mxu1 %v1155_v40 }
 0x412   :  { %1433 = vmatmul.mubr.msk.f32.vlgmr.msra.gmra.mrb[4].mxu1 %vm628_vm10, %v1161_v22 }
 0x415   :  { %v1202_v23 = vpop.permute.xlu0 %1201 }
 0x4e1   :  { %v1273_v24 = vpop.f32.mrb[4].mxu0 }
 0x4e2   :  { %v1274_v42 = vadd.f32 %v1273_v24, %v1202_v23  ;;  %v1275_v43 = vpop.f32.mrb[5].mxu0 }
 0x4e3   :  { %v1276_v48 = vadd.f32 %v1275_v43, %v1202_v23 }
 0x4e5   :  { %v1351_v46 = vadd.f32 %v1276_v48, %v1274_v42  ;;  %v1344_v44 = vpop.f32.mrb[4].mxu1 }
 0x4e6   :  { %v1345_v45 = vadd.f32 %v1344_v44, %v1202_v23  ;;  %v1346_v47 = vpop.f32.mrb[5].mxu1 }
 0x4e7   :  { %v1347_v16 = vadd.f32 %v1346_v47, %v1202_v23 }
 0x4e8   :  { %v1352_v51 = vadd.f32 %v1351_v46, %v1345_v45 }
 0x4ea   :  { %v1353_v52 = vadd.f32 %v1352_v51, %v1347_v16 }
 0x4ec   :  { %1354 = vadd.xlane.f32.xlu1 %v1353_v52 }
 0x4fd   :  { %66 = vperm.xlu1 %1511, %v63_v53  }
 0x501   :  { %1385 = vperm.xlu1 %1511, %v1350_v54  }
 0x579   :  { %v1355_v55 = vpop.xlane.xlu1 %1354 }
 0x57a   :  { %v1356_v56 = vmul.f32 0.001953125, %v1355_v55 }
 0x57c   :  { %v1357_v50 = vsub.f32 %v1274_v42, %v1356_v56  ;;  %v1358_v57 = vsub.f32 %v1276_v48, %v1356_v56  ;;  %v1359_v58 = vsub.f32 %v1345_v45, %v1356_v56  ;;  %v1360_v49 = vsub.f32 %v1347_v16, %v1356_v56 }
 0x57d   :  { %v67_v12 = vpop.permute.xlu1 %66 }
 0x57e   :  { %v1361_v59 = vmul.f32 %v1357_v50, %v1357_v50  ;;  %v1362_v63 = vmul.f32 %v1358_v57, %v1358_v57  ;;  %v1363_v1 = vmul.f32 %v1359_v58, %v1359_v58  ;;  %v1364_v3 = vmul.f32 %v1360_v49, %v1360_v49 }
 0x57f   :  { %v153_v20 = vadd.f32 %v1838_v7, %v67_v12  ;;  %v155_v21 = vadd.f32 %v1842_v61, %v67_v12  ;;  %v224_v25 = vadd.f32 %v1840_v60, %v67_v12  ;;  %v226_v26 = vadd.f32 %v1844_v62, %v67_v12 }
 0x580   :  { %v1365_v2 = vadd.f32 %v1362_v63, %v1361_v59 }
 0x581   :  { %v1386_v27 = vpop.permute.xlu1 %1385 }
 0x582   :  { %v1366_v4 = vadd.f32 %v1365_v2, %v1363_v1 }
 0x584   :  { %v1367_v6 = vadd.f32 %v1366_v4, %v1364_v3 }
 0x586   :  { %1368 = vadd.xlane.f32.xlu0 %v1367_v6 }
 0x613   :  { %v1369_v5 = vpop.xlane.xlu0 %1368 }
 0x614   :  { %v1370_v9 = vmul.f32 0.001953125, %v1369_v5 }
 0x616   :  { %v1371_v10 = vadd.f32 1e-05, %v1370_v9 }
 0x618   :  { %1516 = vrsqrt.f32 %v1371_v10 }
 0x622   :  { %v1517_v8 = vpop.eup %1516 }
 0x623   :  { %v1373_v0 = vmul.f32 %v1517_v8, %v1349_v11 }
 0x625   :  { %1376 = vperm.xlu0 %1510, %v1373_v0  }
 0x6a4   :  { %v1377_v13 = vpop.permute.xlu0 %1376 }
 0x6a5   :  { %v1379_v14 = vmul.f32 %v1377_v13, %v1357_v50  ;;  %v1380_v15 = vmul.f32 %v1377_v13, %v1358_v57  ;;  %v1381_v18 = vmul.f32 %v1377_v13, %v1359_v58  ;;  %v1382_v19 = vmul.f32 %v1377_v13, %v1360_v49 }
 0x6a7   :  { %v1388_v28 = vadd.f32 %v1386_v27, %v1379_v14  ;;  %v1389_v29 = vadd.f32 %v1386_v27, %v1380_v15  ;;  %v1390_v30 = vadd.f32 %v1386_v27, %v1381_v18  ;;  %v1391_v31 = vadd.f32 %v1386_v27, %v1382_v19 }
 0x6a9   :  { %v1392_v32 = vadd.f32 %v1388_v28, %v153_v20  ;;  %v1393_v33 = vadd.f32 %v1389_v29, %v155_v21  ;;  %v1394_v34 = vadd.f32 %v1390_v30, %v224_v25  ;;  %v1395_v17 = vadd.f32 %v1391_v31, %v226_v26 }
 0x6ab   :  { %v1396_v35 = vmax.f32 %v1392_v32, 0.0  ;;  %v1397_v36 = vmax.f32 %v1393_v33, 0.0  ;;  %v1398_v22 = vmax.f32 %v1394_v34, 0.0  ;;  %v1399_v37 = vmax.f32 %v1395_v17, 0.0 }
 0x6ad   :  { %1400 = vst [vmem:[%s2093_s12] sm:$0xff] %v1396_v35  ;;  %1401 = vst [vmem:[%s2093_s12 + $0x8] sm:$0xff] %v1397_v36 }
 0x6ae   :  { %1434 = vst [vmem:[%s2093_s12 + $0x10] sm:$0xff] %v1398_v22  ;;  %1435 = vst [vmem:[%s2093_s12 + $0x18] sm:$0xff] %v1399_v37 }

</bundles_post_ra>
